<compile_context>
chip_gen: v5e
topology: v5e:2x2
jax: 0.10.0
libtpu: 0.0.40
codegen_flags: <defaults>
</compile_context>

<pallas_src>
import jax
import jax.numpy as jnp
from jax import lax
from jax.experimental import pallas as pl
from jax.experimental.pallas import tpu as pltpu


def _make_lightconv_kernel(C1, C2, H, W, k):
    """Build the fused 1x1-conv + BN + depthwise-conv + BN + ReLU kernel."""
    p = k // 2
    HW = H * W
    # Flat zero-padded staging buffer for y1:
    #   vertical pad of p rows top/bottom, plus p extra columns front/back so
    #   every tap slice start (dy*W + dx) is >= 0 and in range.
    PAD_LEN = (H + 2 * p) * W + 2 * p
    CENTER = p * W + p  # flat offset of y1[0, 0] inside the padded scratch

    def kernel(x_ref, w1_ref, s1_ref, b1_ref, w2_ref, s2_ref, b2_ref,
               o_ref, ypad_ref):
        # ---- 1x1 pointwise conv (MXU) + folded BN1, no activation --------
        x = x_ref[0]                                                # (C1, HW)
        y1 = jnp.dot(w1_ref[...], x,
                     preferred_element_type=jnp.float32)            # (C2, HW)
        y1 = y1 * s1_ref[...] + b1_ref[...]                          # BN1 fold

        # ---- stage y1 into the zero-padded flat scratch -------------------
        ypad_ref[...] = jnp.zeros_like(ypad_ref)
        ypad_ref[:, CENTER:CENTER + HW] = y1

        # ---- depthwise k x k conv (VPU) + folded BN2 + ReLU ---------------
        # Horizontal-validity masks: for a tap with horizontal offset dx,
        # output column w is valid iff 0 <= w + dx - p < W.
        col = lax.broadcasted_iota(jnp.int32, (1, HW), 1) % W
        masks = []
        for dx in range(k):
            s = dx - p
            if s == 0:
                masks.append(None)
            else:
                masks.append(jnp.logical_and(col + s >= 0, col + s < W))

        w2 = w2_ref[...]                                             # (C2, k*k)
        acc = jnp.zeros((C2, HW), jnp.float32)
        for dy in range(k):
            for dx in range(k):
                start = dy * W + dx                     # static slice offset
                shifted = ypad_ref[:, start:start + HW]              # (C2, HW)
                if masks[dx] is not None:
                    shifted = jnp.where(masks[dx], shifted, 0.0)
                wt = w2[:, dy * k + dx: dy * k + dx + 1]             # (C2, 1)
                acc = acc + wt * shifted

        y2 = acc * s2_ref[...] + b2_ref[...]                          # BN2 fold
        o_ref[0] = jnp.maximum(y2, 0.0).astype(o_ref.dtype)          # ReLU

    return kernel, PAD_LEN


def _fold_bn(gamma, beta, mean, var, eps=1e-5):
    scale = gamma / jnp.sqrt(var + eps)
    bias = beta - mean * scale
    return scale, bias


def light_conv_forward(x, w1, bn1, w2_dw, bn2, *, k):
    """LightConv forward (NCHW in / NCHW out).

    x     : (N, C1, H, W)
    w1    : (C2, C1, 1, 1)   pointwise conv weight
    bn1   : (gamma, beta, running_mean, running_var), each (C2,)
    w2_dw : (C2, 1, k, k)    depthwise conv weight
    bn2   : (gamma, beta, running_mean, running_var), each (C2,)
    """
    N, C1, H, W = x.shape
    C2 = w1.shape[0]
    HW = H * W

    s1, b1 = _fold_bn(*bn1)
    s2, b2 = _fold_bn(*bn2)

    # Free, contiguous reshapes -> lane-dense (last dim = H*W) layout.
    x2d = x.reshape(N, C1, HW)
    w1_2d = w1.reshape(C2, C1).astype(jnp.float32)
    w2_2d = w2_dw.reshape(C2, k * k).astype(jnp.float32)
    s1 = s1.reshape(C2, 1).astype(jnp.float32)
    b1 = b1.reshape(C2, 1).astype(jnp.float32)
    s2 = s2.reshape(C2, 1).astype(jnp.float32)
    b2 = b2.reshape(C2, 1).astype(jnp.float32)

    kernel, pad_len = _make_lightconv_kernel(C1, C2, H, W, k)

    out2d = pl.pallas_call(
        kernel,
        out_shape=jax.ShapeDtypeStruct((N, C2, HW), x.dtype),
        grid=(N,),
        in_specs=[
            pl.BlockSpec((1, C1, HW), lambda n: (n, 0, 0)),   # x
            pl.BlockSpec((C2, C1), lambda n: (0, 0)),          # w1
            pl.BlockSpec((C2, 1), lambda n: (0, 0)),           # bn1 scale
            pl.BlockSpec((C2, 1), lambda n: (0, 0)),           # bn1 bias
            pl.BlockSpec((C2, k * k), lambda n: (0, 0)),       # w2 (depthwise)
            pl.BlockSpec((C2, 1), lambda n: (0, 0)),           # bn2 scale
            pl.BlockSpec((C2, 1), lambda n: (0, 0)),           # bn2 bias
        ],
        out_specs=pl.BlockSpec((1, C2, HW), lambda n: (n, 0, 0)),
        scratch_shapes=[pltpu.VMEM((C2, pad_len), jnp.float32)],
        compiler_params=pltpu.CompilerParams(
            dimension_semantics=("parallel",)),
    )(x2d, w1_2d, s1, b1, w2_2d, s2, b2)

    return out2d.reshape(N, C2, H, W)


if __name__ == "__main__":
    key = jax.random.PRNGKey(0)
    keys = jax.random.split(key, 11)

    # Small shapes consistent with LightConv: c1=4, c2=32, k=3, 16x16 maps.
    N, C1, C2, H, W, k = 2, 4, 32, 16, 16, 3
    p = k // 2
    eps = 1e-5

    x = jax.random.normal(keys[0], (N, C1, H, W), dtype=jnp.float32)
    w1 = 0.1 * jax.random.normal(keys[1], (C2, C1, 1, 1), dtype=jnp.float32)
    w2 = 0.1 * jax.random.normal(keys[2], (C2, 1, k, k), dtype=jnp.float32)

    g1 = 1.0 + 0.1 * jax.random.normal(keys[3], (C2,), dtype=jnp.float32)
    be1 = 0.1 * jax.random.normal(keys[4], (C2,), dtype=jnp.float32)
    m1 = 0.1 * jax.random.normal(keys[5], (C2,), dtype=jnp.float32)
    v1 = jax.random.uniform(keys[6], (C2,), minval=0.5, maxval=1.5,
                            dtype=jnp.float32)

    g2 = 1.0 + 0.1 * jax.random.normal(keys[7], (C2,), dtype=jnp.float32)
    be2 = 0.1 * jax.random.normal(keys[8], (C2,), dtype=jnp.float32)
    m2 = 0.1 * jax.random.normal(keys[9], (C2,), dtype=jnp.float32)
    v2 = jax.random.uniform(keys[10], (C2,), minval=0.5, maxval=1.5,
                            dtype=jnp.float32)

    out = light_conv_forward(x, w1, (g1, be1, m1, v1), w2, (g2, be2, m2, v2),
                             k=k)
    out = jax.block_until_ready(out)

    # Pure-JAX reference (eval-mode BatchNorm, same semantics as the kernel).
    y1 = lax.conv_general_dilated(
        x, w1, (1, 1), [(0, 0), (0, 0)],
        dimension_numbers=("NCHW", "OIHW", "NCHW"),
        precision=lax.Precision.HIGHEST)
    y1 = (y1 - m1[None, :, None, None]) / jnp.sqrt(v1 + eps)[None, :, None, None]
    y1 = y1 * g1[None, :, None, None] + be1[None, :, None, None]

    y2 = lax.conv_general_dilated(
        y1, w2, (1, 1), [(p, p), (p, p)],
        dimension_numbers=("NCHW", "OIHW", "NCHW"),
        feature_group_count=C2,
        precision=lax.Precision.HIGHEST)
    y2 = (y2 - m2[None, :, None, None]) / jnp.sqrt(v2 + eps)[None, :, None, None]
    y2 = y2 * g2[None, :, None, None] + be2[None, :, None, None]
    ref = jnp.maximum(y2, 0.0)

    assert out.shape == ref.shape, (out.shape, ref.shape)
    max_err = float(jnp.max(jnp.abs(out - ref)))
    assert jnp.allclose(out, ref, rtol=1e-3, atol=1e-3), f"max abs err {max_err}"

    print("KERNEL_OK")
</pallas_src>

<mosaic_0001>
module attributes {stable_mosaic.version = 11 : i64} {
  func.func @kernel(%arg0: i32, %arg1: memref<1x4x256xf32, #tpu.memory_space<vmem>>, %arg2: memref<32x4xf32, #tpu.memory_space<vmem>>, %arg3: memref<32x1xf32, #tpu.memory_space<vmem>>, %arg4: memref<32x1xf32, #tpu.memory_space<vmem>>, %arg5: memref<32x9xf32, #tpu.memory_space<vmem>>, %arg6: memref<32x1xf32, #tpu.memory_space<vmem>>, %arg7: memref<32x1xf32, #tpu.memory_space<vmem>>, %arg8: memref<1x32x256xf32, #tpu.memory_space<vmem>>, %arg9: memref<32x290xf32, #tpu.memory_space<vmem>>) attributes {dimension_semantics = [#tpu.dimension_semantics<parallel>], iteration_bounds = array<i64: 2>, scalar_prefetch = 0 : i64, scratch_operands = 1 : i64, tpu.core_type = #tpu.core_type<tc>, window_params = [{transform_indices = @transform_0, window_bounds = array<i64: 1, 4, 256>}, {pipeline_mode = #tpu.pipeline_mode<synchronous>, transform_indices = @transform_1, window_bounds = array<i64: 32, 4>}, {pipeline_mode = #tpu.pipeline_mode<synchronous>, transform_indices = @transform_2, window_bounds = array<i64: 32, 1>}, {pipeline_mode = #tpu.pipeline_mode<synchronous>, transform_indices = @transform_3, window_bounds = array<i64: 32, 1>}, {pipeline_mode = #tpu.pipeline_mode<synchronous>, transform_indices = @transform_4, window_bounds = array<i64: 32, 9>}, {pipeline_mode = #tpu.pipeline_mode<synchronous>, transform_indices = @transform_5, window_bounds = array<i64: 32, 1>}, {pipeline_mode = #tpu.pipeline_mode<synchronous>, transform_indices = @transform_6, window_bounds = array<i64: 32, 1>}, {transform_indices = @transform_7, window_bounds = array<i64: 1, 32, 256>}]} {
    %c0 = arith.constant 0 : index
    %c0_0 = arith.constant 0 : index
    %c0_1 = arith.constant 0 : index
    %0 = vector.load %arg1[%c0, %c0_0, %c0_1] : memref<1x4x256xf32, #tpu.memory_space<vmem>>, vector<1x4x256xf32>
    %1 = vector.shape_cast %0 : vector<1x4x256xf32> to vector<4x256xf32>
    %c0_2 = arith.constant 0 : index
    %c0_3 = arith.constant 0 : index
    %2 = vector.load %arg2[%c0_2, %c0_3] : memref<32x4xf32, #tpu.memory_space<vmem>>, vector<32x4xf32>
    %cst = arith.constant dense<0.000000e+00> : vector<32x256xf32>
    %3 = tpu.matmul %2, %1, %cst {dimension_numbers = #tpu.dot_dimension_numbers<[1], [0], [0], [1], [0, 0, 1, 1], [], []>} : vector<32x4xf32>, vector<4x256xf32>, vector<32x256xf32> -> vector<32x256xf32>
    %c0_4 = arith.constant 0 : index
    %c0_5 = arith.constant 0 : index
    %4 = vector.load %arg3[%c0_4, %c0_5] : memref<32x1xf32, #tpu.memory_space<vmem>>, vector<32x1xf32>
    %5 = vector.broadcast %4 : vector<32x1xf32> to vector<32x256xf32>
    %6 = arith.mulf %3, %5 : vector<32x256xf32>
    %c0_6 = arith.constant 0 : index
    %c0_7 = arith.constant 0 : index
    %7 = vector.load %arg4[%c0_6, %c0_7] : memref<32x1xf32, #tpu.memory_space<vmem>>, vector<32x1xf32>
    %8 = vector.broadcast %7 : vector<32x1xf32> to vector<32x256xf32>
    %9 = arith.addf %6, %8 : vector<32x256xf32>
    %cst_8 = arith.constant 0.000000e+00 : f32
    %10 = vector.broadcast %cst_8 : f32 to vector<32x290xf32>
    %c0_9 = arith.constant 0 : index
    %c0_10 = arith.constant 0 : index
    %11 = vector.load %arg9[%c0_9, %c0_10] : memref<32x290xf32, #tpu.memory_space<vmem>>, vector<32x290xf32>
    tpu.vector_store %arg9[%c0_9, %c0_10], %10 {strides = array<i32>} : memref<32x290xf32, #tpu.memory_space<vmem>>, vector<32x290xf32>,
    %c0_11 = arith.constant 0 : index
    %c17 = arith.constant 17 : index
    %12 = vector.load %arg9[%c0_11, %c17] : memref<32x290xf32, #tpu.memory_space<vmem>>, vector<32x256xf32>
    tpu.vector_store %arg9[%c0_11, %c17], %9 {strides = array<i32>} : memref<32x290xf32, #tpu.memory_space<vmem>>, vector<32x256xf32>,
    %13 = tpu.iota {dimensions = array<i32: 1>} : vector<1x256xi32>
    %c16_i32 = arith.constant 16 : i32
    %c0_i32 = arith.constant 0 : i32
    %14 = arith.cmpi eq, %c16_i32, %c0_i32 : i32
    %c1_i32 = arith.constant 1 : i32
    %15 = arith.select %14, %c1_i32, %c16_i32 : i32
    %16 = vector.broadcast %15 : i32 to vector<1x256xi32>
    %17 = arith.remsi %13, %16 : vector<1x256xi32>
    %c0_i32_12 = arith.constant 0 : i32
    %18 = vector.broadcast %c0_i32_12 : i32 to vector<1x256xi32>
    %19 = arith.cmpi ne, %17, %18 : vector<1x256xi32>
    %c0_i32_13 = arith.constant 0 : i32
    %20 = vector.broadcast %c0_i32_13 : i32 to vector<1x256xi32>
    %21 = arith.cmpi slt, %17, %20 : vector<1x256xi32>
    %c0_i32_14 = arith.constant 0 : i32
    %22 = arith.cmpi slt, %15, %c0_i32_14 : i32
    %23 = vector.broadcast %22 : i1 to vector<1x256xi1>
    %24 = vector.broadcast %23 : vector<1x256xi1> to vector<1x256xi1>
    %25 = arith.xori %21, %24 : vector<1x256xi1>
    %26 = arith.andi %25, %19 : vector<1x256xi1>
    %27 = vector.broadcast %15 : i32 to vector<1x256xi32>
    %28 = arith.addi %17, %27 : vector<1x256xi32>
    %29 = arith.select %26, %28, %17 : vector<1x256xi1>, vector<1x256xi32>
    %c-1_i32 = arith.constant -1 : i32
    %30 = vector.broadcast %c-1_i32 : i32 to vector<1x256xi32>
    %31 = arith.addi %29, %30 : vector<1x256xi32>
    %c0_i32_15 = arith.constant 0 : i32
    %32 = vector.broadcast %c0_i32_15 : i32 to vector<1x256xi32>
    %33 = arith.cmpi sge, %31, %32 : vector<1x256xi32>
    %c-1_i32_16 = arith.constant -1 : i32
    %34 = vector.broadcast %c-1_i32_16 : i32 to vector<1x256xi32>
    %35 = arith.addi %29, %34 : vector<1x256xi32>
    %c16_i32_17 = arith.constant 16 : i32
    %36 = vector.broadcast %c16_i32_17 : i32 to vector<1x256xi32>
    %37 = arith.cmpi slt, %35, %36 : vector<1x256xi32>
    %38 = arith.andi %33, %37 : vector<1x256xi1>
    %c1_i32_18 = arith.constant 1 : i32
    %39 = vector.broadcast %c1_i32_18 : i32 to vector<1x256xi32>
    %40 = arith.addi %29, %39 : vector<1x256xi32>
    %c0_i32_19 = arith.constant 0 : i32
    %41 = vector.broadcast %c0_i32_19 : i32 to vector<1x256xi32>
    %42 = arith.cmpi sge, %40, %41 : vector<1x256xi32>
    %c1_i32_20 = arith.constant 1 : i32
    %43 = vector.broadcast %c1_i32_20 : i32 to vector<1x256xi32>
    %44 = arith.addi %29, %43 : vector<1x256xi32>
    %c16_i32_21 = arith.constant 16 : i32
    %45 = vector.broadcast %c16_i32_21 : i32 to vector<1x256xi32>
    %46 = arith.cmpi slt, %44, %45 : vector<1x256xi32>
    %47 = arith.andi %42, %46 : vector<1x256xi1>
    %c0_22 = arith.constant 0 : index
    %c0_23 = arith.constant 0 : index
    %48 = vector.load %arg5[%c0_22, %c0_23] : memref<32x9xf32, #tpu.memory_space<vmem>>, vector<32x9xf32>
    %cst_24 = arith.constant 0.000000e+00 : f32
    %49 = vector.broadcast %cst_24 : f32 to vector<32x256xf32>
    %c0_25 = arith.constant 0 : index
    %c0_26 = arith.constant 0 : index
    %50 = vector.load %arg9[%c0_25, %c0_26] : memref<32x290xf32, #tpu.memory_space<vmem>>, vector<32x256xf32>
    %cst_27 = arith.constant 0.000000e+00 : f32
    %51 = vector.shape_cast %38 : vector<1x256xi1> to vector<1x256xi1>
    %52 = vector.broadcast %51 : vector<1x256xi1> to vector<32x256xi1>
    %53 = vector.broadcast %cst_27 : f32 to vector<32x256xf32>
    %54 = arith.select %52, %50, %53 : vector<32x256xi1>, vector<32x256xf32>
    %55 = vector.extract_strided_slice %48 {offsets = [0, 0], sizes = [32, 1], strides = [1, 1]} : vector<32x9xf32> to vector<32x1xf32>
    %56 = vector.broadcast %55 : vector<32x1xf32> to vector<32x256xf32>
    %57 = arith.mulf %56, %54 : vector<32x256xf32>
    %58 = arith.addf %49, %57 : vector<32x256xf32>
    %c0_28 = arith.constant 0 : index
    %c1 = arith.constant 1 : index
    %59 = vector.load %arg9[%c0_28, %c1] : memref<32x290xf32, #tpu.memory_space<vmem>>, vector<32x256xf32>
    %60 = vector.extract_strided_slice %48 {offsets = [0, 1], sizes = [32, 1], strides = [1, 1]} : vector<32x9xf32> to vector<32x1xf32>
    %61 = vector.broadcast %60 : vector<32x1xf32> to vector<32x256xf32>
    %62 = arith.mulf %61, %59 : vector<32x256xf32>
    %63 = arith.addf %58, %62 : vector<32x256xf32>
    %c0_29 = arith.constant 0 : index
    %c2 = arith.constant 2 : index
    %64 = vector.load %arg9[%c0_29, %c2] : memref<32x290xf32, #tpu.memory_space<vmem>>, vector<32x256xf32>
    %cst_30 = arith.constant 0.000000e+00 : f32
    %65 = vector.shape_cast %47 : vector<1x256xi1> to vector<1x256xi1>
    %66 = vector.broadcast %65 : vector<1x256xi1> to vector<32x256xi1>
    %67 = vector.broadcast %cst_30 : f32 to vector<32x256xf32>
    %68 = arith.select %66, %64, %67 : vector<32x256xi1>, vector<32x256xf32>
    %69 = vector.extract_strided_slice %48 {offsets = [0, 2], sizes = [32, 1], strides = [1, 1]} : vector<32x9xf32> to vector<32x1xf32>
    %70 = vector.broadcast %69 : vector<32x1xf32> to vector<32x256xf32>
    %71 = arith.mulf %70, %68 : vector<32x256xf32>
    %72 = arith.addf %63, %71 : vector<32x256xf32>
    %c0_31 = arith.constant 0 : index
    %c16 = arith.constant 16 : index
    %73 = vector.load %arg9[%c0_31, %c16] : memref<32x290xf32, #tpu.memory_space<vmem>>, vector<32x256xf32>
    %cst_32 = arith.constant 0.000000e+00 : f32
    %74 = vector.shape_cast %38 : vector<1x256xi1> to vector<1x256xi1>
    %75 = vector.broadcast %74 : vector<1x256xi1> to vector<32x256xi1>
    %76 = vector.broadcast %cst_32 : f32 to vector<32x256xf32>
    %77 = arith.select %75, %73, %76 : vector<32x256xi1>, vector<32x256xf32>
    %78 = vector.extract_strided_slice %48 {offsets = [0, 3], sizes = [32, 1], strides = [1, 1]} : vector<32x9xf32> to vector<32x1xf32>
    %79 = vector.broadcast %78 : vector<32x1xf32> to vector<32x256xf32>
    %80 = arith.mulf %79, %77 : vector<32x256xf32>
    %81 = arith.addf %72, %80 : vector<32x256xf32>
    %c0_33 = arith.constant 0 : index
    %c17_34 = arith.constant 17 : index
    %82 = vector.load %arg9[%c0_33, %c17_34] : memref<32x290xf32, #tpu.memory_space<vmem>>, vector<32x256xf32>
    %83 = vector.extract_strided_slice %48 {offsets = [0, 4], sizes = [32, 1], strides = [1, 1]} : vector<32x9xf32> to vector<32x1xf32>
    %84 = vector.broadcast %83 : vector<32x1xf32> to vector<32x256xf32>
    %85 = arith.mulf %84, %82 : vector<32x256xf32>
    %86 = arith.addf %81, %85 : vector<32x256xf32>
    %c0_35 = arith.constant 0 : index
    %c18 = arith.constant 18 : index
    %87 = vector.load %arg9[%c0_35, %c18] : memref<32x290xf32, #tpu.memory_space<vmem>>, vector<32x256xf32>
    %cst_36 = arith.constant 0.000000e+00 : f32
    %88 = vector.shape_cast %47 : vector<1x256xi1> to vector<1x256xi1>
    %89 = vector.broadcast %88 : vector<1x256xi1> to vector<32x256xi1>
    %90 = vector.broadcast %cst_36 : f32 to vector<32x256xf32>
    %91 = arith.select %89, %87, %90 : vector<32x256xi1>, vector<32x256xf32>
    %92 = vector.extract_strided_slice %48 {offsets = [0, 5], sizes = [32, 1], strides = [1, 1]} : vector<32x9xf32> to vector<32x1xf32>
    %93 = vector.broadcast %92 : vector<32x1xf32> to vector<32x256xf32>
    %94 = arith.mulf %93, %91 : vector<32x256xf32>
    %95 = arith.addf %86, %94 : vector<32x256xf32>
    %c0_37 = arith.constant 0 : index
    %c32 = arith.constant 32 : index
    %96 = vector.load %arg9[%c0_37, %c32] : memref<32x290xf32, #tpu.memory_space<vmem>>, vector<32x256xf32>
    %cst_38 = arith.constant 0.000000e+00 : f32
    %97 = vector.shape_cast %38 : vector<1x256xi1> to vector<1x256xi1>
    %98 = vector.broadcast %97 : vector<1x256xi1> to vector<32x256xi1>
    %99 = vector.broadcast %cst_38 : f32 to vector<32x256xf32>
    %100 = arith.select %98, %96, %99 : vector<32x256xi1>, vector<32x256xf32>
    %101 = vector.extract_strided_slice %48 {offsets = [0, 6], sizes = [32, 1], strides = [1, 1]} : vector<32x9xf32> to vector<32x1xf32>
    %102 = vector.broadcast %101 : vector<32x1xf32> to vector<32x256xf32>
    %103 = arith.mulf %102, %100 : vector<32x256xf32>
    %104 = arith.addf %95, %103 : vector<32x256xf32>
    %c0_39 = arith.constant 0 : index
    %c33 = arith.constant 33 : index
    %105 = vector.load %arg9[%c0_39, %c33] : memref<32x290xf32, #tpu.memory_space<vmem>>, vector<32x256xf32>
    %106 = vector.extract_strided_slice %48 {offsets = [0, 7], sizes = [32, 1], strides = [1, 1]} : vector<32x9xf32> to vector<32x1xf32>
    %107 = vector.broadcast %106 : vector<32x1xf32> to vector<32x256xf32>
    %108 = arith.mulf %107, %105 : vector<32x256xf32>
    %109 = arith.addf %104, %108 : vector<32x256xf32>
    %c0_40 = arith.constant 0 : index
    %c34 = arith.constant 34 : index
    %110 = vector.load %arg9[%c0_40, %c34] : memref<32x290xf32, #tpu.memory_space<vmem>>, vector<32x256xf32>
    %cst_41 = arith.constant 0.000000e+00 : f32
    %111 = vector.shape_cast %47 : vector<1x256xi1> to vector<1x256xi1>
    %112 = vector.broadcast %111 : vector<1x256xi1> to vector<32x256xi1>
    %113 = vector.broadcast %cst_41 : f32 to vector<32x256xf32>
    %114 = arith.select %112, %110, %113 : vector<32x256xi1>, vector<32x256xf32>
    %115 = vector.extract_strided_slice %48 {offsets = [0, 8], sizes = [32, 1], strides = [1, 1]} : vector<32x9xf32> to vector<32x1xf32>
    %116 = vector.broadcast %115 : vector<32x1xf32> to vector<32x256xf32>
    %117 = arith.mulf %116, %114 : vector<32x256xf32>
    %118 = arith.addf %109, %117 : vector<32x256xf32>
    %c0_42 = arith.constant 0 : index
    %c0_43 = arith.constant 0 : index
    %119 = vector.load %arg6[%c0_42, %c0_43] : memref<32x1xf32, #tpu.memory_space<vmem>>, vector<32x1xf32>
    %120 = vector.broadcast %119 : vector<32x1xf32> to vector<32x256xf32>
    %121 = arith.mulf %118, %120 : vector<32x256xf32>
    %c0_44 = arith.constant 0 : index
    %c0_45 = arith.constant 0 : index
    %122 = vector.load %arg7[%c0_44, %c0_45] : memref<32x1xf32, #tpu.memory_space<vmem>>, vector<32x1xf32>
    %123 = vector.broadcast %122 : vector<32x1xf32> to vector<32x256xf32>
    %124 = arith.addf %121, %123 : vector<32x256xf32>
    %cst_46 = arith.constant 0.000000e+00 : f32
    %125 = vector.broadcast %cst_46 : f32 to vector<32x256xf32>
    %126 = arith.maximumf %124, %125 : vector<32x256xf32>
    %c0_47 = arith.constant 0 : index
    %c0_48 = arith.constant 0 : index
    %c0_49 = arith.constant 0 : index
    %127 = vector.load %arg8[%c0_47, %c0_48, %c0_49] : memref<1x32x256xf32, #tpu.memory_space<vmem>>, vector<1x32x256xf32>
    %128 = vector.shape_cast %127 : vector<1x32x256xf32> to vector<32x256xf32>
    %129 = vector.shape_cast %126 : vector<32x256xf32> to vector<1x32x256xf32>
    tpu.vector_store %arg8[%c0_47, %c0_48, %c0_49], %129 {strides = array<i32>} : memref<1x32x256xf32, #tpu.memory_space<vmem>>, vector<1x32x256xf32>,
    return
  }
  func.func @transform_0(%arg0: i32) -> (i32, i32, i32) {
    %c0_i32 = arith.constant 0 : i32
    %c0_i32_0 = arith.constant 0 : i32
    %c0_i32_1 = arith.constant 0 : i32
    return %arg0, %c0_i32, %c0_i32_0 : i32, i32, i32
  }
  func.func @transform_1(%arg0: i32) -> (i32, i32) {
    %c0_i32 = arith.constant 0 : i32
    %c0_i32_0 = arith.constant 0 : i32
    %c0_i32_1 = arith.constant 0 : i32
    return %c0_i32, %c0_i32_0 : i32, i32
  }
  func.func @transform_2(%arg0: i32) -> (i32, i32) {
    %c0_i32 = arith.constant 0 : i32
    %c0_i32_0 = arith.constant 0 : i32
    %c0_i32_1 = arith.constant 0 : i32
    return %c0_i32, %c0_i32_0 : i32, i32
  }
  func.func @transform_3(%arg0: i32) -> (i32, i32) {
    %c0_i32 = arith.constant 0 : i32
    %c0_i32_0 = arith.constant 0 : i32
    %c0_i32_1 = arith.constant 0 : i32
    return %c0_i32, %c0_i32_0 : i32, i32
  }
  func.func @transform_4(%arg0: i32) -> (i32, i32) {
    %c0_i32 = arith.constant 0 : i32
    %c0_i32_0 = arith.constant 0 : i32
    %c0_i32_1 = arith.constant 0 : i32
    return %c0_i32, %c0_i32_0 : i32, i32
  }
  func.func @transform_5(%arg0: i32) -> (i32, i32) {
    %c0_i32 = arith.constant 0 : i32
    %c0_i32_0 = arith.constant 0 : i32
    %c0_i32_1 = arith.constant 0 : i32
    return %c0_i32, %c0_i32_0 : i32, i32
  }
  func.func @transform_6(%arg0: i32) -> (i32, i32) {
    %c0_i32 = arith.constant 0 : i32
    %c0_i32_0 = arith.constant 0 : i32
    %c0_i32_1 = arith.constant 0 : i32
    return %c0_i32, %c0_i32_0 : i32, i32
  }
  func.func @transform_7(%arg0: i32) -> (i32, i32, i32) {
    %c0_i32 = arith.constant 0 : i32
    %c0_i32_0 = arith.constant 0 : i32
    %c0_i32_1 = arith.constant 0 : i32
    return %arg0, %c0_i32, %c0_i32_0 : i32, i32, i32
  }
}

</mosaic_0001>

<bundles_post_ra>
// kernel: tpu_custom_call.1
= control target key start
LH: loop header
LB: loop body
LE: loop exit
PB: predicated region body
PF: predicated region fallthrough
CT: control target
= control target key end

     0   :  { %12 = vsyncpa [#allocation4], 0  ;;  %s2501_s0 = inlined_call_operand.vmem [shape: f32[2,4,256], index: 0, kind: input, shape index: {}]   ;;  %s2502_s1 = inlined_call_operand.vmem [shape: f32[32,4], index: 1, kind: input, shape index: {}]   ;;  %s2503_s2 = inlined_call_operand.vmem [shape: f32[32,1], index: 2, kind: input, shape index: {}]   ;;  %s2504_s3 = inlined_call_operand.vmem [shape: f32[32,1], index: 3, kind: input, shape index: {}]   ;;  %s2505_s4 = inlined_call_operand.vmem [shape: f32[32,9], index: 4, kind: input, shape index: {}]   ;;  %s2506_s5 = inlined_call_operand.vmem [shape: f32[32,1], index: 5, kind: input, shape index: {}]   ;;  %s2507_s6 = inlined_call_operand.vmem [shape: f32[32,1], index: 6, kind: input, shape index: {}]   ;;  %s2508_s7 = inlined_call_operand.hbm [shape: f32[2,32,256], index: 7, kind: output, shape index: {}]  }
   0x1   :  { %14 = vsyncpa [#allocation4 + $0x1], 0  ;;  %s1699_s24 = smov 0   ;;  %s1701_s25 = smov 0  }
   0x2   :  { %s1703_s26 = smov 0   ;;  %s1705_s27 = smov 0  }
   0x3 LB: > { %s1720_s28 = sadd.s32 4294967295, %s1636_s27   ;;  %s1454_s29 = sadd.s32 4294967294, %s1636_s27   ;;  %s1636_s27 = sphi %s1705_s27, %s2514_s27   ;;  %s1632_s26 = sphi %s1703_s26, %s2513_s26   ;;  %s1628_s25 = sphi %s1701_s25, %s2512_s25   ;;  %s1624_s24 = sphi %s1699_s24, %s2511_s24  }
   0x4   : > { %s1724_s30 = sadd.s32 1, %s1636_s27   ;;  %s179_s8 = sadd.s32 1, %s1632_s26 }
   0x5   : > { %s176_s9 = ssub.s32 %s1636_s27, %s1724_s30  ;;  %p189_p0 = scmp.ne.s32.totalorder %s1632_s26, %s1628_s25 }
   0x6   : > { %p177_p1 = scmp.eq.s32.totalorder %s176_s9, 0  ;;  %p190_p2 = scmp.eq.s32.totalorder %s1720_s28, 1 }
   0x7   : > { %p195_p3 = scmp.ne.s32.totalorder %s1628_s25, %s1624_s24  ;;  %p196_p4 = scmp.eq.s32.totalorder %s1454_s29, 1 }
   0x8   : > { %s1735_s10 = scalar_select %p177_p1, %s1632_s26, %s179_s8  }
   0x9   : > { %p1737_p5 = por %p190_p2, %p189_p0  ;;  %p1741_p6 = por %p196_p4, %p195_p3 }
   0xa   : > { %p1457_p7 = scmp.ge.s32.totalorder %s1636_s27, 1  ;;  %p240_p8 = scmp.lt.s32.totalorder %s1636_s27, 3 }
   0xc   : > { %p241_p9 = pnand %p1457_p7, %p240_p8 }
   0xd   : > { %p272_p10 = scmp.lt.s32.totalorder (!%p241_p9), %s1720_s28, 1  ;;  %s1644_s22 = smov (!%p241_p9), 17  }
   0xe   : > { %244 = sbr.rel (%p241_p9) target bundleno = 811 (0x32b), region = 48  ;;  %s1647_s29 = smov (!%p241_p9), 126  }
   0xf   : > { %s1648_s8 = smov (!%p241_p9), 110   ;;  %s1649_s9 = smov (!%p241_p9), 96  }
  0x10   : > { %s1650_s13 = smov (!%p241_p9), 127   ;;  %s1651_s14 = smov (!%p241_p9), 111  }
  0x11   : > { %s1654_s16 = smov (!%p241_p9), 95  }
  0x13   : > { %v362_v0 = vld [vmem:[%s2503_s2] sm:$0xff]  ;;  %v1638_v1 = vmov 0   ;;  %s273_s15 = scalar_select %p272_p10, %s1720_s28, 1  ;;  %v364_v2 = vld [vmem:[%s2503_s2 + $0x10] sm:$0xff]  ;;  %v363_v5 = vld [vmem:[%s2503_s2 + $0x8] sm:$0xff]  ;;  %vm299_vm0 = vcmask 1043456  }
  0x14   : > { %1540 = vset.pattern.permute.xlu0 %v1638_v1  ;;  %1541 = vset.pattern.permute.xlu1 %v1638_v1  ;;  %v394_v3 = vld [vmem:[%s2504_s3] sm:$0xff]  ;;  %v365_v6 = vld [vmem:[%s2503_s2 + $0x18] sm:$0xff]  ;;  %v395_v7 = vld [vmem:[%s2504_s3 + $0x8] sm:$0xff]  ;;  %vm286_vm1 = vcmask 31744   ;;  %v1639_v19 = vmov 1   ;;  %v1640_v21 = vmov 2  }
  0x15   : > { %368 = vperm.xlu0 %1540, %v362_v0   ;;  %1542 = vset.pattern.permute.xlu2 %v1638_v1  ;;  %s1476_s20 = sshll.u32 %s273_s15, 3  ;;  %v278_v8 = vld [vmem:[%s2502_s1] sm:$0xff]  ;;  %v280_v9 = vld [vmem:[%s2502_s1 + $0x10] sm:$0xff]  ;;  %v397_v13 = vld [vmem:[%s2504_s3 + $0x18] sm:$0xff]  ;;  %v1641_v22 = vmov 3   ;;  %v1642_v23 = vmov 4  }
  0x16   : > { %378 = vperm.xlu1 %1541, %v364_v2   ;;  %400 = vperm.xlu2 %1542, %v394_v3   ;;  %s276_s23 = scalar_lea.vmem %s2501_s0, %s1476_s20  ;;  %v396_v12 = vld [vmem:[%s2504_s3 + $0x10] sm:$0xff]  ;;  %v1790_v14 = vld [vmem:[%s2505_s4 + $0x8] sm:$0xff]  ;;  %v281_v16 = vld [vmem:[%s2502_s1 + $0x18] sm:$0xff]  ;;  %v1643_v24 = vmov 5   ;;  %v1645_v58 = vmov 0.0   ;;  %vm428_vm2 = vcmask 277504  }
  0x17   : > { %v277_v4 = vld [vmem:[%s276_s23] sm:$0xff]  ;;  %v279_v15 = vld [vmem:[%s2502_s1 + $0x8] sm:$0xff]  ;;  %v1804_v17 = vld [vmem:[%s2505_s4 + $0x10] sm:$0xff]  ;;  %426 = vst [vmem:[#allocation2] sm:$0xff] %v1645_v58  ;;  %vm480_vm3 = vcmask 1047688   ;;  %vm463_vm4 = vcmask 138240  }
  0x18   : > { %283 = vst [vmem:[#allocation1] ss:$2 sm:$0xff] %v277_v4  ;;  %v1809_v18 = vld [vmem:[%s2505_s4] sm:$0xff]  ;;  %v1821_v20 = vld [vmem:[%s2505_s4 + $0x18] sm:$0xff]  ;;  %s1646_s23 = smov 112   ;;  %vm818_vm5 = vcmask 916480  }
  0x19   : > { %430 = vst [vmem:[#allocation2 + $0x18] sm:$0xff] %v1645_v58  ;;  %vm737_vm6 = vcmask 1031168   ;;  %vm1069_vm7 = vcmask 785408   ;;  %vm988_vm8 = vcmask 900096   ;;  %vm672_vm13 = vcmask 1039360   ;;  %s1656_s15 = smov 94  }
  0x1a   : > { %433 = vst [vmem:[#allocation2 + $0x30] sm:$0xff] %v1645_v58  ;;  %vm939_vm14 = vcmask 908288   ;;  %vm1190_vm15 = vcmask 777216  }
  0x1b   : > { %436 = vst [vmem:[#allocation2 + $0x48] sm:$0xff] %v1645_v58 }
  0x1c   : > { %432 = vst.msk [vmem:[#allocation2 + $0x28] sm:$0xff] %vm428_vm2, %v1645_v58 }
  0x1d   : > { %373 = vperm.xlu0 %1540, %v363_v5   ;;  %429 = vst.msk [vmem:[#allocation2 + $0x10] sm:$0xff] %vm428_vm2, %v1645_v58 }
  0x1e   : > { %383 = vperm.xlu1 %1541, %v365_v6   ;;  %405 = vperm.xlu2 %1542, %v395_v7   ;;  %435 = vst.msk [vmem:[#allocation2 + $0x40] sm:$0xff] %vm428_vm2, %v1645_v58 }
  0x1f   : > { %v284_v10 = vld.sshfl [vmem:[#allocation1] sm:$0xff pattern:$0x75316420]  ;;  %v285_v11 = vld.sshfl [vmem:[#allocation1 + $0x8] sm:$0xff pattern:$0x75316420] }
  0x20   : > { %1461 = vmatpush.msk.msra.mxu0 %vm299_vm0, %v284_v10  ;;  %1478 = vmatpush.msk.msra.mxu2 %vm299_vm0, %v284_v10  ;;  %438 = vst.msk [vmem:[#allocation2 + $0x58] sm:$0xff] %vm428_vm2, %v1645_v58 }
  0x21   : > { %1466 = vmatpush.msk.msra.mxu1 %vm299_vm0, %v285_v11  ;;  %1479 = vmatpush.msk.msra.mxu3 %vm299_vm0, %v285_v11  ;;  %vm1239_vm0 = vcmask 769024  }
  0x22   : > { %1462 = vmatmul.msk.f32.vlgmr.msra.gmra.mxu0 %vm286_vm1, %v278_v8  ;;  %1464 = vmatmul.msk.f32.vlgmr.msra.gmra.mxu2 %vm286_vm1, %v280_v9 }
  0x23   : > { %1467 = vmatmul.msk.f32.vlgmr.msra.gmra.mxu1 %vm286_vm1, %v278_v8  ;;  %1469 = vmatmul.msk.f32.vlgmr.msra.gmra.mxu3 %vm286_vm1, %v280_v9 }
  0x25   : > { %410 = vperm.xlu0 %1540, %v396_v12  }
  0x26   : > { %415 = vperm.xlu1 %1541, %v397_v13   ;;  %567 = vperm.xlu2 %1542, %v1790_v14  }
  0x2a   : > { %1463 = vmatmul.msk.f32.gmra.mxu0 %vm286_vm1, %v279_v15  ;;  %1465 = vmatmul.msk.f32.gmra.mxu2 %vm286_vm1, %v281_v16 }
  0x2b   : > { %1468 = vmatmul.msk.f32.gmra.mxu1 %vm286_vm1, %v279_v15  ;;  %1470 = vmatmul.msk.f32.gmra.mxu3 %vm286_vm1, %v281_v16 }
  0x2d   : > { %572 = vperm.xlu0 %1540, %v1804_v17  }
  0x2e   : > { %562 = vperm.xlu1 %1541, %v1809_v18   ;;  %1543 = vset.pattern.permute.xlu2 %v1639_v19 }
  0x2f   : > { %609 = vperm.xlu2 %1543, %v1809_v18  }
  0x35   : > { %1544 = vset.pattern.permute.xlu0 %v1639_v19 }
  0x36   : > { %577 = vperm.xlu1 %1541, %v1821_v20   ;;  %613 = vperm.xlu0 %1544, %v1790_v14  }
  0x37   : > { %621 = vperm.xlu2 %1543, %v1821_v20  }
  0x3e   : > { %1545 = vset.pattern.permute.xlu1 %v1639_v19  ;;  %1548 = vset.pattern.permute.xlu0 %v1640_v21 }
  0x3f   : > { %617 = vperm.xlu1 %1545, %v1804_v17   ;;  %1547 = vset.pattern.permute.xlu2 %v1640_v21 }
  0x40   : > { %771 = vperm.xlu0 %1548, %v1804_v17   ;;  %767 = vperm.xlu2 %1547, %v1790_v14  }
  0x47   : > { %1546 = vset.pattern.permute.xlu1 %v1640_v21 }
  0x48   : > { %763 = vperm.xlu1 %1546, %v1809_v18   ;;  %1549 = vset.pattern.permute.xlu0 %v1641_v22 }
  0x49   : > { %1551 = vset.pattern.permute.xlu2 %v1641_v22  ;;  %844 = vperm.xlu0 %1549, %v1809_v18  }
  0x4a   : > { %852 = vperm.xlu2 %1551, %v1804_v17  }
  0x50   : > { %775 = vperm.xlu1 %1546, %v1821_v20  }
  0x51   : > { %1553 = vset.pattern.permute.xlu0 %v1642_v23 }
  0x52   : > { %1552 = vset.pattern.permute.xlu2 %v1642_v23  ;;  %880 = vperm.xlu0 %1553, %v1790_v14  }
  0x53   : > { %876 = vperm.xlu2 %1552, %v1809_v18  }
  0x58   : > { %1550 = vset.pattern.permute.xlu1 %v1641_v22 }
  0x59   : > { %848 = vperm.xlu1 %1550, %v1790_v14  }
  0x5a   : > { %1557 = vset.pattern.permute.xlu0 %v1643_v24 }
  0x5b   : > { %888 = vperm.xlu2 %1552, %v1821_v20   ;;  %1022 = vperm.xlu0 %1557, %v1804_v17  }
  0x61   : > { %856 = vperm.xlu1 %1550, %v1821_v20  }
  0x63   : > { %1556 = vset.pattern.permute.xlu2 %v1643_v24 }
  0x64   : > { %1018 = vperm.xlu2 %1556, %v1790_v14  }
  0x69   : > { %1554 = vset.pattern.permute.xlu1 %v1642_v23 }
  0x6a   : > { %884 = vperm.xlu1 %1554, %v1804_v17  }
  0x70   : > { %v401_v27 = vpop.permute.xlu2 %400 }
  0x72   : > { %1555 = vset.pattern.permute.xlu1 %v1643_v24 }
  0x73   : > { %1014 = vperm.xlu1 %1555, %v1809_v18  }
  0x78   : > { %v406_v37 = vpop.permute.xlu2 %405 }
  0x7b   : > { %1026 = vperm.xlu1 %1555, %v1821_v20  }
  0x80   : > { %v1848_v54 = vpop.permute.xlu2 %567 }
  0x87   : > { %v369_v25 = vpop.permute.xlu0 %368 }
  0x88   : > { %v379_v26 = vpop.permute.xlu1 %378 }
  0x89   : > { %v1853_v59 = vpop.permute.xlu2 %609 }
  0x8f   : > { %v374_v28 = vpop.permute.xlu0 %373 }
  0x90   : > { %v384_v35 = vpop.permute.xlu1 %383 }
  0x91   : > { %v1857_v61 = vpop.permute.xlu2 %621 }
  0x97   : > { %v411_v41 = vpop.permute.xlu0 %410 }
  0x98   : > { %v416_v52 = vpop.permute.xlu1 %415 }
  0x9a   : > { %v1861_v63 = vpop.permute.xlu2 %767 }
  0x9f   : > { %v321_v29 = vpop.f32.mrf.mxu0  ;;  %v1869_v4 = vpop.permute.xlu0 %572 }
  0xa0   : > { %v386_v30 = vmul.f32 %v369_v25, %v321_v29  ;;  %v350_v31 = vpop.f32.mrf.mxu1  ;;  %v1855_v60 = vpop.permute.xlu1 %562 }
  0xa1   : > { %v387_v32 = vmul.f32 %v369_v25, %v350_v31 }
  0xa2   : > { %v418_v33 = vadd.f32 %v401_v27, %v386_v30 }
  0xa3   : > { %v419_v34 = vadd.f32 %v401_v27, %v387_v32 }
  0xa4   : > { %447 = vrot.lane.b32.xlu2 %v418_v33, %s1644_s22  ;;  %v1865_v2 = vpop.permute.xlu2 %852 }
  0xa5   : > { %449 = vrot.lane.b32.xlu0 %v419_v34, %s1644_s22  ;;  %v327_v36 = vpop.f32.mrf.mxu2 }
  0xa6   : > { %v356_v38 = vpop.f32.mrf.mxu3  ;;  %v390_v39 = vmul.f32 %v379_v26, %v327_v36 }
  0xa7   : > { %v391_v40 = vmul.f32 %v379_v26, %v356_v38  ;;  %v324_v45 = vpop.f32.mrf.mxu0 }
  0xa8   : > { %v353_v42 = vpop.f32.mrf.mxu1  ;;  %v422_v46 = vadd.f32 %v411_v41, %v390_v39  ;;  %v388_v48 = vmul.f32 %v374_v28, %v324_v45  ;;  %v1859_v62 = vpop.permute.xlu1 %577 }
  0xa9   : > { %v423_v43 = vadd.f32 %v411_v41, %v391_v40  ;;  %v389_v44 = vmul.f32 %v374_v28, %v353_v42  ;;  %v1875_v7 = vpop.permute.xlu0 %613 }
  0xaa   : > { %v420_v55 = vadd.f32 %v406_v37, %v388_v48 }
  0xab   : > { %v421_v47 = vadd.f32 %v406_v37, %v389_v44  ;;  %457 = vrot.lane.b32.xlu1 %v423_v43, %s1644_s22 }
  0xad   : > { %455 = vrot.lane.b32.xlu0 %v422_v46, %s1644_s22  ;;  %453 = vrot.lane.b32.xlu2 %v421_v47, %s1644_s22  ;;  %v330_v49 = vpop.f32.mrf.mxu2  ;;  %v1871_v5 = vpop.permute.xlu2 %876 }
  0xae   : > { %v392_v50 = vmul.f32 %v384_v35, %v330_v49  ;;  %v359_v51 = vpop.f32.mrf.mxu3 }
  0xaf   : > { %v393_v53 = vmul.f32 %v384_v35, %v359_v51 }
  0xb0   : > { %v424_v56 = vadd.f32 %v416_v52, %v392_v50 }
  0xb1   : > { %v425_v57 = vadd.f32 %v416_v52, %v393_v53  ;;  %v1863_v0 = vpop.permute.xlu1 %617 }
  0xb2   : > { %v1881_v10 = vpop.permute.xlu0 %771 }
  0xb3   : > { %451 = vrot.lane.b32.xlu1 %v420_v55, %s1644_s22 }
  0xb5   : > { %461 = vrot.lane.b32.xlu0 %v425_v57, %s1644_s22  ;;  %459 = vrot.lane.b32.xlu2 %v424_v56, %s1644_s22  ;;  %v1877_v8 = vpop.permute.xlu2 %888 }
  0xba   : > { %v1867_v3 = vpop.permute.xlu1 %763 }
  0xbb   : > { %v1887_v13 = vpop.permute.xlu0 %844 }
  0xbe   : > { %v1883_v11 = vpop.permute.xlu2 %1018 }
  0xc2   : > { %v1873_v6 = vpop.permute.xlu1 %775 }
  0xc4   : > { %v1892_v19 = vpop.permute.xlu0 %880 }
  0xcb   : > { %v1879_v9 = vpop.permute.xlu1 %848 }
  0xcd   : > { %v1903_v24 = vpop.permute.xlu0 %1022 }
  0xd3   : > { %v1885_v12 = vpop.permute.xlu1 %856 }
  0xdc   : > { %v1890_v16 = vpop.permute.xlu1 %884 }
  0xe5   : > { %v1901_v23 = vpop.permute.xlu1 %1014 }
  0xed   : > { %v1908_v26 = vpop.permute.xlu1 %1026 }
  0xfe   : > { %v448_v15 = vpop.permute.xlu2 %447 }
  0xff   : > { %481 = vst.msk [vmem:[#allocation2] sm:$0xff] %vm480_vm3, %v448_v15 }
 0x106   : > { %v1894_v21 = vld [vmem:[#allocation2] sm:$0xff] }
 0x107   : > { %v454_v22 = vpop.permute.xlu2 %453  ;;  %794 = vrot.lane.b32.xlu2 %v1894_v21, %s1646_s23  ;;  %713 = vrot.lane.b32.xlu1 %v1894_v21, %s1647_s29  ;;  %v624_v36 = vmul.f32 %v1853_v59, %v1894_v21  ;;  %v891_v39 = vmul.f32 %v1871_v5, %v1894_v21 }
 0x108   : > { %486 = vst.msk [vmem:[#allocation2 + $0x28] sm:$0xff] %vm463_vm4, %v454_v22 }
 0x10f   : > { %v460_v25 = vpop.permute.xlu2 %459  ;;  %964 = vrot.lane.b32.xlu1 %v1894_v21, %s1648_s8  ;;  %v1993_v48 = vld [vmem:[#allocation2 + $0x28] sm:$0xff] }
 0x110   : > { %490 = vst.msk [vmem:[#allocation2 + $0x48] sm:$0xff] %vm480_vm3, %v460_v25  ;;  %v629_v57 = vmul.f32 %v1875_v7, %v1993_v48 }
 0x117   : > { %v450_v27 = vpop.permute.xlu0 %449 }
 0x118   : > { %v1911_v28 = vsel %vm463_vm4, %v448_v15, %v450_v27  ;;  %483 = vst.msk [vmem:[#allocation2 + $0x10] sm:$0xff] %vm463_vm4, %v450_v27  ;;  %v493_v27 = vlaneseq }
 0x119   : > { %796 = vrot.lane.b32.xlu1 %v1911_v28, %s1646_s23  ;;  %v625_v43 = vmul.f32 %v1853_v59, %v1911_v28  ;;  %v892_v44 = vmul.f32 %v1871_v5, %v1911_v28 }
 0x11d   : > { %v458_v29 = vpop.permute.xlu1 %457 }
 0x11e   : > { %489 = vst.msk [vmem:[#allocation2 + $0x40] sm:$0xff] %vm463_vm4, %v458_v29 }
 0x11f   : > { %v456_v30 = vpop.permute.xlu0 %455  ;;  %v1917_v31 = vld [vmem:[#allocation2 + $0x10] sm:$0xff] }
 0x120   : > { %v1920_v32 = vsel %vm463_vm4, %v456_v30, %v458_v29  ;;  %487 = vst.msk [vmem:[#allocation2 + $0x30] sm:$0xff] %vm480_vm3, %v456_v30  ;;  %717 = vrot.lane.b32.xlu0 %v1917_v31, %s1647_s29  ;;  %798 = vrot.lane.b32.xlu2 %v1917_v31, %s1646_s23  ;;  %v626_v38 = vmul.f32 %v1853_v59, %v1917_v31 }
 0x121   : > { %1047 = vrot.lane.b32.xlu1 %v1911_v28, %s1649_s9  ;;  %v893_v40 = vmul.f32 %v1871_v5, %v1917_v31  ;;  %v631_v52 = vmul.f32 %v1863_v0, %v1920_v32  ;;  %v896_v5 = vmul.f32 %v1892_v19, %v1993_v48  ;;  %v898_v15 = vmul.f32 %v1890_v16, %v1920_v32 }
 0x125   : > { %v452_v33 = vpop.permute.xlu1 %451  ;;  %v1961_v42 = vld [vmem:[#allocation2 + $0x40] sm:$0xff] }
 0x126   : > { %v1930_v34 = vsel %vm463_vm4, %v452_v33, %v454_v22  ;;  %484 = vst.msk [vmem:[#allocation2 + $0x18] sm:$0xff] %vm480_vm3, %v452_v33  ;;  %v632_v46 = vmul.f32 %v1863_v0, %v1961_v42  ;;  %v899_v50 = vmul.f32 %v1890_v16, %v1961_v42  ;;  %v2037_v22 = vld [vmem:[#allocation2 + $0x48] sm:$0xff] }
 0x127   : > { %v462_v35 = vpop.permute.xlu0 %461  ;;  %v1957_v41 = vld [vmem:[#allocation2 + $0x30] sm:$0xff] }
 0x128   : > { %v1936_v37 = vsel %vm463_vm4, %v460_v25, %v462_v35  ;;  %492 = vst.msk [vmem:[#allocation2 + $0x58] sm:$0xff] %vm463_vm4, %v462_v35  ;;  %968 = vrot.lane.b32.xlu0 %v1917_v31, %s1648_s8  ;;  %1045 = vrot.lane.b32.xlu2 %v1894_v21, %s1649_s9  ;;  %v630_v45 = vmul.f32 %v1863_v0, %v1957_v41  ;;  %v494_v35 = vand.u32 127, %v493_v27 }
 0x129   : > { %648 = vrot.lane.b32.xlu1 %v624_v36, %s1650_s13  ;;  %v897_v49 = vmul.f32 %v1890_v16, %v1957_v41  ;;  %v633_v27 = vmul.f32 %v1857_v61, %v2037_v22 }
 0x12a   : > { %v495_v16 = vadd.s32 128, %v494_v35 }
 0x12d   : > { %v1989_v47 = vld [vmem:[#allocation2 + $0x18] sm:$0xff] }
 0x12e   : > { %v627_v53 = vmul.f32 %v1875_v7, %v1989_v47  ;;  %v894_v58 = vmul.f32 %v1892_v19, %v1989_v47 }
 0x12f   : > { %v2043_v36 = vld [vmem:[#allocation2 + $0x58] sm:$0xff] }
 0x130   : > { %652 = vrot.lane.b32.xlu0 %v626_v38, %s1650_s13  ;;  %1049 = vrot.lane.b32.xlu2 %v1917_v31, %s1649_s9 }
 0x131   : > { %915 = vrot.lane.b32.xlu1 %v891_v39, %s1651_s14 }
 0x138   : > { %919 = vrot.lane.b32.xlu0 %v893_v40, %s1651_s14  ;;  %715 = vrot.lane.b32.xlu2 %v1911_v28, %s1647_s29 }
 0x139   : > { %725 = vrot.lane.b32.xlu1 %v1957_v41, %s1647_s29 }
 0x140   : > { %729 = vrot.lane.b32.xlu0 %v1961_v42, %s1647_s29  ;;  %966 = vrot.lane.b32.xlu2 %v1911_v28, %s1648_s8 }
 0x141   : > { %976 = vrot.lane.b32.xlu1 %v1957_v41, %s1648_s8 }
 0x148   : > { %806 = vrot.lane.b32.xlu0 %v1957_v41, %s1646_s23  ;;  %650 = vrot.lane.b32.xlu2 %v625_v43, %s1650_s13 }
 0x149   : > { %808 = vrot.lane.b32.xlu1 %v1920_v32, %s1646_s23 }
 0x150   : > { %980 = vrot.lane.b32.xlu0 %v1961_v42, %s1648_s8  ;;  %917 = vrot.lane.b32.xlu2 %v892_v44, %s1651_s14 }
 0x151   : > { %660 = vrot.lane.b32.xlu1 %v630_v45, %s1650_s13  ;;  %v500_v45 = vand.u32 15, %v494_v35 }
 0x158   : > { %664 = vrot.lane.b32.xlu0 %v632_v46, %s1650_s13  ;;  %810 = vrot.lane.b32.xlu2 %v1961_v42, %s1646_s23  ;;  %v507_v46 = vand.u32 15, %v495_v16 }
 0x159   : > { %719 = vrot.lane.b32.xlu1 %v1989_v47, %s1647_s29 }
 0x160   : > { %727 = vrot.lane.b32.xlu2 %v1920_v32, %s1647_s29  ;;  %723 = vrot.lane.b32.xlu0 %v1993_v48, %s1647_s29 }
 0x161   : > { %927 = vrot.lane.b32.xlu1 %v897_v49, %s1651_s14  ;;  %v795_v51 = vpop.permute.xlu2 %794 }
 0x168   : > { %978 = vrot.lane.b32.xlu2 %v1920_v32, %s1648_s8  ;;  %800 = vrot.lane.b32.xlu0 %v1989_v47, %s1646_s23 }
 0x169   : > { %970 = vrot.lane.b32.xlu1 %v1989_v47, %s1648_s8 }
 0x170   : > { %804 = vrot.lane.b32.xlu2 %v1993_v48, %s1646_s23  ;;  %931 = vrot.lane.b32.xlu0 %v899_v50, %s1651_s14 }
 0x171   : > { %802 = vrot.lane.b32.xlu1 %v1930_v34, %s1646_s23 }
 0x178   : > { %662 = vrot.lane.b32.xlu2 %v631_v52, %s1650_s13  ;;  %974 = vrot.lane.b32.xlu0 %v1993_v48, %s1648_s8  ;;  %v2061_v52 = vadd.s32 4294967295, %v500_v45 }
 0x179   : > { %v714_v55 = vpop.permute.xlu1 %713  ;;  %654 = vrot.lane.b32.xlu1 %v627_v53, %s1650_s13  ;;  %v2063_v53 = vadd.s32 4294967295, %v507_v46 }
 0x17a   : > { %v799_v56 = vpop.permute.xlu2 %798  ;;  %vm522_vm9 = vcmp.ge.s32.totalorder %v2061_v52, 0 }
 0x17b   : > { %vm523_vm10 = vcmp.ge.s32.totalorder %v2063_v53, 0 }
 0x180   : > { %658 = vrot.lane.b32.xlu0 %v629_v57, %s1650_s13  ;;  %721 = vrot.lane.b32.xlu2 %v1930_v34, %s1647_s29 }
 0x181   : > { %v965_v59 = vpop.permute.xlu1 %964  ;;  %921 = vrot.lane.b32.xlu1 %v894_v58, %s1651_s14 }
 0x182   : > { %v1046_v0 = vpop.permute.xlu2 %1045 }
 0x188   : > { %925 = vrot.lane.b32.xlu0 %v896_v5, %s1651_s14  ;;  %929 = vrot.lane.b32.xlu2 %v898_v15, %s1651_s14  ;;  %v895_v15 = vmul.f32 %v1892_v19, %v1930_v34 }
 0x189   : > { %731 = vrot.lane.b32.xlu1 %v2037_v22, %s1647_s29 }
 0x18a   : > { %v1050_v25 = vpop.permute.xlu2 %1049 }
 0x18b   : > { %v797_v29 = vpop.permute.xlu1 %796 }
 0x18c   : > { %v819_v30 = vsel %vm818_vm5, %v795_v51, %v797_v29  ;;  %v820_v33 = vsel %vm818_vm5, %v797_v29, %v799_v56  ;;  %v628_v51 = vmul.f32 %v1875_v7, %v1930_v34  ;;  %v2072_v56 = vadd.s32 1, %v507_v46 }
 0x18e   : > { %vm533_vm12 = vcmp.lt.s32.totalorder %v2072_v56, 16 }
 0x190   : > { %735 = vrot.lane.b32.xlu0 %v2043_v36, %s1647_s29  ;;  %972 = vrot.lane.b32.xlu2 %v1930_v34, %s1648_s8 }
 0x191   : > { %982 = vrot.lane.b32.xlu1 %v2037_v22, %s1648_s8 }
 0x192   : > { %v718_v38 = vpop.permute.xlu0 %717  ;;  %v716_v39 = vpop.permute.xlu2 %715 }
 0x193   : > { %v738_v40 = vsel %vm737_vm6, %v714_v55, %v716_v39  ;;  %v739_v43 = vsel %vm737_vm6, %v716_v39, %v718_v38  ;;  %v1048_v44 = vpop.permute.xlu1 %1047  ;;  %v2070_v55 = vadd.s32 1, %v500_v45  ;;  %v836_v45 = vsel %vm523_vm10, %v820_v33, 0.0 }
 0x194   : > { %v2054_v49 = vsel %vm1069_vm7, %v1046_v0, %v1048_v44  ;;  %v2057_v50 = vsel %vm1069_vm7, %v1048_v44, %v1050_v25  ;;  %v553_v25 = vsel %vm523_vm10, %v1911_v28, 0.0  ;;  %v755_v29 = vsel %vm533_vm12, %v739_v43, 0.0 }
 0x195   : > { %vm532_vm11 = vcmp.lt.s32.totalorder %v2070_v55, 16  ;;  %v581_v16 = vmul.f32 %v1855_v60, %v553_v25  ;;  %v835_v44 = vsel %vm522_vm9, %v819_v30, 0.0  ;;  %v860_v30 = vmul.f32 %v1887_v13, %v836_v45 }
 0x196   : > { %v754_v19 = vsel %vm532_vm11, %v738_v40, 0.0  ;;  %v859_v25 = vmul.f32 %v1887_v13, %v835_v44  ;;  %v1652_v13 = vmov 6  }
 0x197   : > { %v778_v43 = vmul.f32 %v1867_v3, %v754_v19  ;;  %1558 = vset.pattern.permute.xlu0 %v1652_v13  ;;  %1559 = vset.pattern.permute.xlu1 %v1652_v13 }
 0x198   : > { %812 = vrot.lane.b32.xlu0 %v2037_v22, %s1646_s23  ;;  %656 = vrot.lane.b32.xlu2 %v628_v51, %s1650_s13 }
 0x199   : > { %814 = vrot.lane.b32.xlu1 %v1936_v37, %s1646_s23  ;;  %1560 = vset.pattern.permute.xlu2 %v1652_v13 }
 0x19a   : > { %v969_v57 = vpop.permute.xlu0 %968  ;;  %v967_v58 = vpop.permute.xlu2 %966 }
 0x19b   : > { %v989_v7 = vsel %vm988_vm8, %v965_v59, %v967_v58  ;;  %v990_v0 = vsel %vm988_vm8, %v967_v58, %v969_v57  ;;  %v649_v5 = vpop.permute.xlu1 %648  ;;  %v552_v59 = vsel %vm522_vm9, %v1894_v21, 0.0  ;;  %v779_v57 = vmul.f32 %v1867_v3, %v755_v29 }
 0x19c   : > { %v580_v39 = vmul.f32 %v1855_v60, %v552_v59  ;;  %v635_v60 = vmul.f32 %v1857_v61, %v2043_v36  ;;  %v1005_v19 = vsel %vm532_vm11, %v989_v7, 0.0  ;;  %v1006_v29 = vsel %vm533_vm12, %v990_v0, 0.0 }
 0x19d   : > { %v1029_v45 = vmul.f32 %v1901_v23, %v1005_v19  ;;  %v1030_v7 = vmul.f32 %v1901_v23, %v1006_v29 }
 0x1a0   : > { %986 = vrot.lane.b32.xlu0 %v2043_v36, %s1648_s8  ;;  %923 = vrot.lane.b32.xlu2 %v895_v15, %s1651_s14 }
 0x1a1   : > { %666 = vrot.lane.b32.xlu1 %v633_v27, %s1650_s13  ;;  %v900_v27 = vmul.f32 %v1877_v8, %v2037_v22 }
 0x1a2   : > { %v653_v35 = vpop.permute.xlu0 %652  ;;  %v651_v38 = vpop.permute.xlu2 %650 }
 0x1a3   : > { %v674_v46 = vsel %vm672_vm13, %v651_v38, %v653_v35  ;;  %v673_v40 = vsel %vm672_vm13, %v649_v5, %v651_v38  ;;  %v916_v51 = vpop.permute.xlu1 %915 }
 0x1a4   : > { %v690_v58 = vadd.f32 %v674_v46, %v581_v16  ;;  %v689_v15 = vadd.f32 %v673_v40, %v580_v39 }
 0x1a6   : > { %v787_v59 = vadd.f32 %v779_v57, %v690_v58  ;;  %v786_v33 = vadd.f32 %v778_v43, %v689_v15  ;;  %v902_v57 = vmul.f32 %v1877_v8, %v2043_v36 }
 0x1a8   : > { %670 = vrot.lane.b32.xlu0 %v635_v60, %s1650_s13  ;;  %816 = vrot.lane.b32.xlu2 %v2043_v36, %s1646_s23  ;;  %v868_v3 = vadd.f32 %v860_v30, %v787_v59  ;;  %v867_v5 = vadd.f32 %v859_v25, %v786_v33 }
 0x1a9   : > { %933 = vrot.lane.b32.xlu1 %v900_v27, %s1651_s14 }
 0x1aa   : > { %v920_v35 = vpop.permute.xlu0 %919  ;;  %v918_v16 = vpop.permute.xlu2 %917 }
 0x1ab   : > { %v941_v38 = vsel %vm939_vm14, %v918_v16, %v920_v35  ;;  %v940_v39 = vsel %vm939_vm14, %v916_v51, %v918_v16  ;;  %v726_v44 = vpop.permute.xlu1 %725  ;;  %v901_v16 = vmul.f32 %v1877_v8, %v1936_v37 }
 0x1ac   : > { %v957_v46 = vadd.f32 %v941_v38, %v868_v3  ;;  %v956_v40 = vadd.f32 %v940_v39, %v867_v5  ;;  %v634_v3 = vmul.f32 %v1857_v61, %v1936_v37 }
 0x1ae   : > { %v2126_v0 = vadd.f32 %v1030_v7, %v957_v46  ;;  %v2128_v43 = vadd.f32 %v1029_v45, %v956_v40  ;;  %v557_v45 = vsel %vm523_vm10, %v1920_v32, 0.0 }
 0x1b0   : > { %937 = vrot.lane.b32.xlu0 %v902_v57, %s1651_s14  ;;  %733 = vrot.lane.b32.xlu2 %v1936_v37, %s1647_s29  ;;  %v585_v57 = vmul.f32 %v1869_v4, %v557_v45 }
 0x1b1   : > { %1053 = vrot.lane.b32.xlu1 %v1930_v34, %s1649_s9 }
 0x1b2   : > { %v730_v51 = vpop.permute.xlu0 %729  ;;  %v811_v58 = vpop.permute.xlu2 %810 }
 0x1b3   : > { %v977_v23 = vpop.permute.xlu1 %976 }
 0x1b8   : > { %1051 = vrot.lane.b32.xlu0 %v1989_v47, %s1649_s9  ;;  %984 = vrot.lane.b32.xlu2 %v1936_v37, %s1648_s8 }
 0x1b9   : > { %1059 = vrot.lane.b32.xlu1 %v1920_v32, %s1649_s9 }
 0x1ba   : > { %v807_v15 = vpop.permute.xlu0 %806  ;;  %v728_v60 = vpop.permute.xlu2 %727 }
 0x1bb   : > { %v742_v25 = vsel %vm737_vm6, %v726_v44, %v728_v60  ;;  %v743_v30 = vsel %vm737_vm6, %v728_v60, %v730_v51  ;;  %v809_v59 = vpop.permute.xlu1 %808  ;;  %v556_v44 = vsel %vm522_vm9, %v1957_v41, 0.0 }
 0x1bc   : > { %v823_v33 = vsel %vm818_vm5, %v807_v15, %v809_v59  ;;  %v824_v27 = vsel %vm818_vm5, %v809_v59, %v811_v58  ;;  %v758_v8 = vsel %vm532_vm11, %v742_v25, 0.0  ;;  %v759_v7 = vsel %vm533_vm12, %v743_v30, 0.0 }
 0x1bd   : > { %v584_v40 = vmul.f32 %v1869_v4, %v556_v44  ;;  %v839_v58 = vsel %vm522_vm9, %v823_v33, 0.0  ;;  %v782_v30 = vmul.f32 %v1881_v10, %v758_v8  ;;  %v783_v59 = vmul.f32 %v1881_v10, %v759_v7 }
 0x1be   : > { %v863_v4 = vmul.f32 %v1865_v2, %v839_v58  ;;  %v1653_v44 = vmov 7  }
 0x1c0   : > { %1057 = vrot.lane.b32.xlu0 %v1957_v41, %s1649_s9  ;;  %668 = vrot.lane.b32.xlu2 %v634_v3, %s1650_s13  ;;  %s269_s13 = sand.u32 1, %s1628_s25  }
 0x1c1   : > { %1065 = vrot.lane.b32.xlu1 %v1936_v37, %s1649_s9  ;;  %s1377_s21 = scalar_lea.sflag [#allocation4], %s269_s13 }
 0x1c2   : > { %v981_v5 = vpop.permute.xlu0 %980  ;;  %v979_v19 = vpop.permute.xlu2 %978 }
 0x1c3   : > { %v993_v29 = vsel %vm988_vm8, %v977_v23, %v979_v19  ;;  %v994_v13 = vsel %vm988_vm8, %v979_v19, %v981_v5  ;;  %v661_v35 = vpop.permute.xlu1 %660  ;;  %v840_v23 = vsel %vm523_vm10, %v824_v27, 0.0 }
 0x1c4   : > { %v864_v19 = vmul.f32 %v1865_v2, %v840_v23  ;;  %v1009_v7 = vsel %vm532_vm11, %v993_v29, 0.0 }
 0x1c8   : > { %1063 = vrot.lane.b32.xlu0 %v2037_v22, %s1649_s9  ;;  %935 = vrot.lane.b32.xlu2 %v901_v16, %s1651_s14  ;;  %s1458_s14 = sshll.u32 %s269_s13, 6 }
 0x1c9   : > { %1099 = vperm.xlu1 %1559, %v1790_v14  }
 0x1ca   : > { %v665_v61 = vpop.permute.xlu0 %664  ;;  %v805_v38 = vpop.permute.xlu2 %804 }
 0x1cb   : > { %v720_v39 = vpop.permute.xlu1 %719 }
 0x1d0   : > { %1095 = vperm.xlu0 %1558, %v1809_v18   ;;  %1055 = vrot.lane.b32.xlu2 %v1993_v48, %s1649_s9 }
 0x1d1   : > { %1107 = vperm.xlu1 %1559, %v1821_v20  }
 0x1d2   : > { %v724_v46 = vpop.permute.xlu0 %723  ;;  %v663_v51 = vpop.permute.xlu2 %662 }
 0x1d3   : > { %v677_v15 = vsel %vm672_vm13, %v661_v35, %v663_v51  ;;  %v678_v60 = vsel %vm672_vm13, %v663_v51, %v665_v61  ;;  %v928_v25 = vpop.permute.xlu1 %927  ;;  %v1033_v51 = vmul.f32 %v1903_v24, %v1009_v7 }
 0x1d4   : > { %v693_v3 = vadd.f32 %v677_v15, %v584_v40  ;;  %v694_v5 = vadd.f32 %v678_v60, %v585_v57  ;;  %v1010_v40 = vsel %vm533_vm12, %v994_v13, 0.0 }
 0x1d5   : > { %v1034_v58 = vmul.f32 %v1903_v24, %v1010_v40 }
 0x1d6   : > { %v790_v16 = vadd.f32 %v782_v30, %v693_v3  ;;  %v791_v33 = vadd.f32 %v783_v59, %v694_v5 }
 0x1d8   : > { %1562 = vset.pattern.permute.xlu0 %v1653_v44  ;;  %1061 = vrot.lane.b32.xlu2 %v1961_v42, %s1649_s9  ;;  %v871_v27 = vadd.f32 %v863_v4, %v790_v16  ;;  %v872_v35 = vadd.f32 %v864_v19, %v791_v33  ;;  %v555_v19 = vsel %vm523_vm10, %v1930_v34, 0.0 }
 0x1d9   : > { %1131 = vperm.xlu0 %1562, %v1790_v14   ;;  %1563 = vset.pattern.permute.xlu1 %v1653_v44 }
 0x1da   : > { %v801_v61 = vpop.permute.xlu0 %800  ;;  %v722_v10 = vpop.permute.xlu2 %721  ;;  %1135 = vperm.xlu1 %1563, %v1804_v17  }
 0x1db   : > { %v740_v45 = vsel %vm737_vm6, %v720_v39, %v722_v10  ;;  %v741_v2 = vsel %vm737_vm6, %v722_v10, %v724_v46  ;;  %v971_v8 = vpop.permute.xlu1 %970 }
 0x1dc   : > { %v756_v16 = vsel %vm532_vm11, %v740_v45, 0.0 }
 0x1e0   : > { %1067 = vrot.lane.b32.xlu2 %v2043_v36, %s1649_s9  ;;  %s1594_s9 = scalar_lea.hbm %s2508_s7, 128 }
 0x1e2   : > { %v932_v14 = vpop.permute.xlu0 %931  ;;  %v930_v57 = vpop.permute.xlu2 %929 }
 0x1e3   : > { %v944_v39 = vsel %vm939_vm14, %v928_v25, %v930_v57  ;;  %v945_v46 = vsel %vm939_vm14, %v930_v57, %v932_v14  ;;  %v803_v23 = vpop.permute.xlu1 %802 }
 0x1e4   : > { %v960_v15 = vadd.f32 %v944_v39, %v871_v27  ;;  %v961_v60 = vadd.f32 %v945_v46, %v872_v35  ;;  %v821_v29 = vsel %vm818_vm5, %v801_v61, %v803_v23  ;;  %v822_v13 = vsel %vm818_vm5, %v803_v23, %v805_v38 }
 0x1e5   : > { %v554_v38 = vsel %vm522_vm9, %v1989_v47, 0.0  ;;  %v583_v35 = vmul.f32 %v1848_v54, %v555_v19  ;;  %v837_v10 = vsel %vm522_vm9, %v821_v29, 0.0 }
 0x1e6   : > { %v2206_v30 = vadd.f32 %v1033_v51, %v960_v15  ;;  %v2208_v59 = vadd.f32 %v1034_v58, %v961_v60  ;;  %v582_v61 = vmul.f32 %v1848_v54, %v554_v38  ;;  %v861_v57 = vmul.f32 %v1879_v9, %v837_v10 }
 0x1e8   : > { %1103 = vperm.xlu2 %1560, %v1804_v17   ;;  %v757_v17 = vsel %vm533_vm12, %v741_v2, 0.0  ;;  %v780_v2 = vmul.f32 %v1861_v63, %v756_v16 }
 0x1ea   : > { %v975_v3 = vpop.permute.xlu0 %974  ;;  %v973_v5 = vpop.permute.xlu2 %972 }
 0x1eb   : > { %v991_v24 = vsel %vm988_vm8, %v971_v8, %v973_v5  ;;  %v992_v25 = vsel %vm988_vm8, %v973_v5, %v975_v3  ;;  %v655_v4 = vpop.permute.xlu1 %654 }
 0x1ec   : > { %v1007_v23 = vsel %vm532_vm11, %v991_v24, 0.0  ;;  %v1008_v15 = vsel %vm533_vm12, %v992_v25, 0.0 }
 0x1ed   : > { %v1032_v5 = vmul.f32 %v1883_v11, %v1008_v15 }
 0x1f0   : > { %1561 = vset.pattern.permute.xlu2 %v1653_v44  ;;  %v838_v44 = vsel %vm523_vm10, %v822_v13, 0.0 }
 0x1f1   : > { %1127 = vperm.xlu2 %1561, %v1809_v18   ;;  %v781_v18 = vmul.f32 %v1861_v63, %v757_v17  ;;  %v862_v54 = vmul.f32 %v1879_v9, %v838_v44  ;;  %v1031_v9 = vmul.f32 %v1883_v11, %v1007_v23 }
 0x1f2   : > { %v659_v33 = vpop.permute.xlu0 %658  ;;  %v657_v27 = vpop.permute.xlu2 %656 }
 0x1f3   : > { %v676_v8 = vsel %vm672_vm13, %v657_v27, %v659_v33  ;;  %v675_v45 = vsel %vm672_vm13, %v655_v4, %v657_v27  ;;  %v922_v7 = vpop.permute.xlu1 %921 }
 0x1f4   : > { %v692_v40 = vadd.f32 %v676_v8, %v583_v35  ;;  %v691_v14 = vadd.f32 %v675_v45, %v582_v61 }
 0x1f6   : > { %v789_v51 = vadd.f32 %v781_v18, %v692_v40  ;;  %v788_v58 = vadd.f32 %v780_v2, %v691_v14  ;;  %v559_v18 = vsel %vm523_vm10, %v1936_v37, 0.0  ;;  %v558_v40 = vsel %vm522_vm9, %v2037_v22, 0.0 }
 0x1f8   : > { %v870_v39 = vadd.f32 %v862_v54, %v789_v51  ;;  %v869_v46 = vadd.f32 %v861_v57, %v788_v58  ;;  %v587_v51 = vmul.f32 %v1859_v62, %v559_v18 }
 0x1f9   : > { %1139 = vperm.xlu2 %1561, %v1821_v20  }
 0x1fa   : > { %v926_v60 = vpop.permute.xlu0 %925  ;;  %v924_v63 = vpop.permute.xlu2 %923 }
 0x1fb   : > { %v943_v29 = vsel %vm939_vm14, %v924_v63, %v926_v60  ;;  %v942_v13 = vsel %vm939_vm14, %v922_v7, %v924_v63  ;;  %v732_v3 = vpop.permute.xlu1 %731 }
 0x1fc   : > { %v959_v4 = vadd.f32 %v943_v29, %v870_v39  ;;  %v958_v19 = vadd.f32 %v942_v13, %v869_v46  ;;  %v586_v39 = vmul.f32 %v1859_v62, %v558_v40 }
 0x1fe   : > { %v2245_v38 = vadd.f32 %v1032_v5, %v959_v4  ;;  %v2247_v24 = vadd.f32 %v1031_v9, %v958_v19 }
 0x202   : > { %v736_v25 = vpop.permute.xlu0 %735  ;;  %v817_v16 = vpop.permute.xlu2 %816 }
 0x203   : > { %v983_v20 = vpop.permute.xlu1 %982 }
 0x20a   : > { %v813_v17 = vpop.permute.xlu0 %812  ;;  %v734_v33 = vpop.permute.xlu2 %733 }
 0x20b   : > { %v744_v27 = vsel %vm737_vm6, %v732_v3, %v734_v33  ;;  %v745_v35 = vsel %vm737_vm6, %v734_v33, %v736_v25  ;;  %v815_v61 = vpop.permute.xlu1 %814 }
 0x20c   : > { %v825_v10 = vsel %vm818_vm5, %v813_v17, %v815_v61  ;;  %v826_v11 = vsel %vm818_vm5, %v815_v61, %v817_v16  ;;  %v760_v14 = vsel %vm532_vm11, %v744_v27, 0.0  ;;  %v761_v57 = vsel %vm533_vm12, %v745_v35, 0.0 }
 0x20d   : > { %v841_v46 = vsel %vm522_vm9, %v825_v10, 0.0  ;;  %v842_v23 = vsel %vm523_vm10, %v826_v11, 0.0  ;;  %v784_v29 = vmul.f32 %v1873_v6, %v760_v14  ;;  %v785_v13 = vmul.f32 %v1873_v6, %v761_v57 }
 0x20e   : > { %v865_v5 = vmul.f32 %v1885_v12, %v841_v46  ;;  %v866_v62 = vmul.f32 %v1885_v12, %v842_v23 }
 0x212   : > { %v987_v44 = vpop.permute.xlu0 %986  ;;  %v985_v8 = vpop.permute.xlu2 %984 }
 0x213   : > { %v995_v45 = vsel %vm988_vm8, %v983_v20, %v985_v8  ;;  %v996_v7 = vsel %vm988_vm8, %v985_v8, %v987_v44  ;;  %v667_v2 = vpop.permute.xlu1 %666 }
 0x214   : > { %v1011_v20 = vsel %vm532_vm11, %v995_v45, 0.0  ;;  %v1012_v17 = vsel %vm533_vm12, %v996_v7, 0.0 }
 0x215   : > { %v1035_v10 = vmul.f32 %v1908_v26, %v1011_v20  ;;  %v1036_v12 = vmul.f32 %v1908_v26, %v1012_v17 }
 0x21a   : > { %v671_v54 = vpop.permute.xlu0 %670  ;;  %v669_v58 = vpop.permute.xlu2 %668 }
 0x21b   : > { %v680_v15 = vsel %vm672_vm13, %v669_v58, %v671_v54  ;;  %v679_v60 = vsel %vm672_vm13, %v667_v2, %v669_v58  ;;  %v934_v63 = vpop.permute.xlu1 %933 }
 0x21c   : > { %v696_v3 = vadd.f32 %v680_v15, %v587_v51  ;;  %v695_v9 = vadd.f32 %v679_v60, %v586_v39 }
 0x21e   : > { %v793_v4 = vadd.f32 %v785_v13, %v696_v3  ;;  %v792_v19 = vadd.f32 %v784_v29, %v695_v9 }
 0x220   : > { %v874_v25 = vadd.f32 %v866_v62, %v793_v4  ;;  %v873_v16 = vadd.f32 %v865_v5, %v792_v19  ;;  %v1086_v62 = vsel %vm522_vm9, %v2054_v49, 0.0  ;;  %v1087_v4 = vsel %vm523_vm10, %v2057_v50, 0.0 }
 0x222   : > { %v938_v33 = vpop.permute.xlu0 %937  ;;  %v936_v27 = vpop.permute.xlu2 %935 }
 0x223   : > { %v947_v6 = vsel %vm939_vm14, %v936_v27, %v938_v33  ;;  %v946_v35 = vsel %vm939_vm14, %v934_v63, %v936_v27  ;;  %v1054_v61 = vpop.permute.xlu1 %1053 }
 0x224   : > { %v963_v11 = vadd.f32 %v947_v6, %v874_v25  ;;  %v962_v44 = vadd.f32 %v946_v35, %v873_v16 }
 0x226   : > { %v1044_v8 = vadd.f32 %v1036_v12, %v963_v11  ;;  %v1043_v2 = vadd.f32 %v1035_v10, %v962_v44 }
 0x22a   : > { %v1052_v18 = vpop.permute.xlu0 %1051  ;;  %v1056_v45 = vpop.permute.xlu2 %1055 }
 0x22b   : > { %v1072_v40 = vsel %vm1069_vm7, %v1052_v18, %v1054_v61  ;;  %v1073_v7 = vsel %vm1069_vm7, %v1054_v61, %v1056_v45  ;;  %v1060_v14 = vpop.permute.xlu1 %1059 }
 0x22c   : > { %v1088_v60 = vsel %vm522_vm9, %v1072_v40, 0.0  ;;  %v1089_v63 = vsel %vm523_vm10, %v1073_v7, 0.0 }
 0x232   : > { %v1058_v57 = vpop.permute.xlu0 %1057  ;;  %v1062_v54 = vpop.permute.xlu2 %1061 }
 0x233   : > { %v1074_v51 = vsel %vm1069_vm7, %v1058_v57, %v1060_v14  ;;  %v1075_v58 = vsel %vm1069_vm7, %v1060_v14, %v1062_v54  ;;  %v1066_v39 = vpop.permute.xlu1 %1065 }
 0x234   : > { %v1090_v16 = vsel %vm522_vm9, %v1074_v51, 0.0 }
 0x23a   : > { %v1064_v46 = vpop.permute.xlu0 %1063  ;;  %v1068_v26 = vpop.permute.xlu2 %1067 }
 0x23b   : > { %v1076_v23 = vsel %vm1069_vm7, %v1064_v46, %v1066_v39  ;;  %v1077_v15 = vsel %vm1069_vm7, %v1066_v39, %v1068_v26  ;;  %v1100_v29 = vpop.permute.xlu1 %1099  ;;  %v1655_v39 = vmov 8  }
 0x23c   : > { %v1112_v13 = vmul.f32 %v1100_v29, %v1088_v60  ;;  %v1113_v3 = vmul.f32 %v1100_v29, %v1089_v63  ;;  %v1093_v20 = vsel %vm523_vm10, %v1077_v15, 0.0  ;;  %1566 = vset.pattern.permute.xlu0 %v1655_v39  ;;  %1564 = vset.pattern.permute.xlu1 %v1655_v39 }
 0x23d   : > { %1565 = vset.pattern.permute.xlu2 %v1655_v39 }
 0x23e   : > { %v2296_v9 = vadd.f32 %v1112_v13, %v2247_v24  ;;  %v2299_v5 = vadd.f32 %v1113_v3, %v2245_v38  ;;  %v1091_v24 = vsel %vm523_vm10, %v1075_v58, 0.0  ;;  %v1092_v38 = vsel %vm522_vm9, %v1076_v23, 0.0 }
 0x242   : > { %v1096_v19 = vpop.permute.xlu0 %1095  ;;  %v1104_v25 = vpop.permute.xlu2 %1103 }
 0x243   : > { %v1110_v17 = vmul.f32 %v1096_v19, %v1086_v62  ;;  %v1111_v49 = vmul.f32 %v1096_v19, %v1087_v4  ;;  %v1114_v33 = vmul.f32 %v1104_v25, %v1090_v16  ;;  %v1115_v27 = vmul.f32 %v1104_v25, %v1091_v24  ;;  %v1108_v6 = vpop.permute.xlu1 %1107 }
 0x244   : > { %v1116_v50 = vmul.f32 %v1108_v6, %v1092_v38  ;;  %v1117_v35 = vmul.f32 %v1108_v6, %v1093_v20 }
 0x245   : > { %v2316_v61 = vadd.f32 %v1110_v17, %v2128_v43  ;;  %v2319_v10 = vadd.f32 %v1111_v49, %v2126_v0  ;;  %v2322_v12 = vadd.f32 %v1114_v33, %v2206_v30  ;;  %v2325_v52 = vadd.f32 %v1115_v27, %v2208_v59 }
 0x246   : > { %v2327_v53 = vadd.f32 %v1116_v50, %v1043_v2  ;;  %v2329_v11 = vadd.f32 %v1117_v35, %v1044_v8 }
 0x24b   : > { %v1128_v44 = vpop.permute.xlu2 %1127  ;;  %v1132_v0 = vpop.permute.xlu0 %1131 }
 0x24c   : > { %v1142_v18 = vmul.f32 %v1128_v44, %v1894_v21  ;;  %v1143_v45 = vmul.f32 %v1128_v44, %v1911_v28  ;;  %v1144_v43 = vmul.f32 %v1128_v44, %v1917_v31  ;;  %v1145_v30 = vmul.f32 %v1132_v0, %v1989_v47  ;;  %v1136_v8 = vpop.permute.xlu1 %1135 }
 0x24d   : > { %v1146_v59 = vmul.f32 %v1132_v0, %v1930_v34  ;;  %v1147_v2 = vmul.f32 %v1132_v0, %v1993_v48  ;;  %v1148_v40 = vmul.f32 %v1136_v8, %v1957_v41  ;;  %v1149_v7 = vmul.f32 %v1136_v8, %v1920_v32 }
 0x24e   : > { %1166 = vrot.lane.b32.xlu1 %v1142_v18, %s1654_s16  ;;  %1170 = vrot.lane.b32.xlu0 %v1144_v43, %s1654_s16  ;;  %v1150_v14 = vmul.f32 %v1136_v8, %v1961_v42 }
 0x24f   : > { %1168 = vrot.lane.b32.xlu2 %v1143_v45, %s1654_s16 }
 0x253   : > { %v1140_v57 = vpop.permute.xlu2 %1139 }
 0x254   : > { %v1151_v54 = vmul.f32 %v1140_v57, %v2037_v22  ;;  %v1152_v51 = vmul.f32 %v1140_v57, %v1936_v37  ;;  %v1153_v58 = vmul.f32 %v1140_v57, %v2043_v36 }
 0x256   : > { %1172 = vrot.lane.b32.xlu1 %v1145_v30, %s1654_s16  ;;  %1176 = vrot.lane.b32.xlu0 %v1147_v2, %s1654_s16 }
 0x257   : > { %1174 = vrot.lane.b32.xlu2 %v1146_v59, %s1654_s16 }
 0x25e   : > { %1178 = vrot.lane.b32.xlu1 %v1148_v40, %s1654_s16  ;;  %1182 = vrot.lane.b32.xlu0 %v1150_v14, %s1654_s16 }
 0x25f   : > { %1180 = vrot.lane.b32.xlu2 %v1149_v7, %s1654_s16 }
 0x266   : > { %1184 = vrot.lane.b32.xlu1 %v1151_v54, %s1654_s16  ;;  %1188 = vrot.lane.b32.xlu0 %v1153_v58, %s1654_s16 }
 0x267   : > { %1186 = vrot.lane.b32.xlu2 %v1152_v51, %s1654_s16  ;;  %s2445_s16 = scalar_lea.vmem [#allocation3], %s1458_s14 }
 0x26e   : > { %1215 = vrot.lane.b32.xlu1 %v1894_v21, %s1656_s15  ;;  %1219 = vrot.lane.b32.xlu0 %v1917_v31, %s1656_s15  ;;  %v1570_v21 = vld [vmem:[%s2505_s4] sm:$0xff]  ;;  %v1572_v31 = vld [vmem:[%s2505_s4 + $0x8] sm:$0xff] }
 0x26f   : > { %1217 = vrot.lane.b32.xlu2 %v1911_v28, %s1656_s15  ;;  %v1571_v28 = vld [vmem:[%s2505_s4 + $0x10] sm:$0xff] }
 0x276   : > { %1221 = vrot.lane.b32.xlu1 %v1989_v47, %s1656_s15  ;;  %1225 = vrot.lane.b32.xlu0 %v1993_v48, %s1656_s15  ;;  %v1328_v47 = vld [vmem:[%s2507_s6] sm:$0xff]  ;;  %v1329_v48 = vld [vmem:[%s2507_s6 + $0x8] sm:$0xff] }
 0x277   : > { %1223 = vrot.lane.b32.xlu2 %v1930_v34, %s1656_s15  ;;  %v1299_v34 = vld [vmem:[%s2506_s5 + $0x18] sm:$0xff] }
 0x27e   : > { %1227 = vrot.lane.b32.xlu1 %v1957_v41, %s1656_s15  ;;  %1231 = vrot.lane.b32.xlu0 %v1961_v42, %s1656_s15  ;;  %v1297_v41 = vld [vmem:[%s2506_s5 + $0x8] sm:$0xff]  ;;  %v1298_v42 = vld [vmem:[%s2506_s5 + $0x10] sm:$0xff] }
 0x27f   : > { %1229 = vrot.lane.b32.xlu2 %v1920_v32, %s1656_s15  ;;  %v1296_v32 = vld [vmem:[%s2506_s5] sm:$0xff] }
 0x286   : > { %1233 = vrot.lane.b32.xlu1 %v2037_v22, %s1656_s15  ;;  %1237 = vrot.lane.b32.xlu0 %v2043_v36, %s1656_s15  ;;  %v1330_v36 = vld [vmem:[%s2507_s6 + $0x10] sm:$0xff] }
 0x287   : > { %1235 = vrot.lane.b32.xlu2 %v1936_v37, %s1656_s15  ;;  %v1573_v37 = vld [vmem:[%s2505_s4 + $0x18] sm:$0xff]  ;;  %s1477_s15 = sshll.u32 %s1720_s28, 6  ;;  %s1389_s28 = sshll.u32 %s2445_s16, 4  ;;  %s1390_s28 = int_to_ptr.vmem [resolvable:$true] %s1389_s28 }
 0x288   : > { %s1388_s19 = scalar_lea.hbm %s2508_s7, %s1477_s15 }
 0x289   : > { %s1391_s20 = sshll.u32 %s1388_s19, 4  ;;  %s1392_s20 = int_to_ptr.hbm [resolvable:$true] %s1391_s20 }
 0x28a   : > { %s1588_s22 = sshra.s32 %s1392_s20, 4  ;;  %s1589_s22 = int_to_ptr.hbm [resolvable:$true] %s1588_s22 }
 0x28b   : > { %s1590_s23 = scalar_lea.hbm %s1589_s22, 64  ;;  %p1595_p0 = scmp.lt.s32.totalorder %s1589_s22, %s2508_s7 }
 0x28c   : > { %p1591_p11 = scmp.ne.s32.totalorder %s1589_s22, %s1590_s23  ;;  %p1596_p1 = scmp.lt.s32.totalorder %s1594_s9, %s1590_s23 }
 0x28e   : > { %1265 = vperm.xlu1 %1564, %v1570_v21   ;;  %1273 = vperm.xlu0 %1566, %v1571_v28   ;;  %p1592_p12 = pnand %p1591_p11, %p1737_p5  ;;  %p1597_p2 = por %p1596_p1, %p1595_p0 }
 0x28f   : > { %1269 = vperm.xlu2 %1565, %v1572_v31  }
 0x290   : > { %p1593_p13 = pneg %p1592_p12 }
 0x292   : > { %p1598_p3 = pnand %p1597_p2, %p1593_p13 }
 0x296   : > { %1277 = vperm.xlu1 %1564, %v1573_v37   ;;  %1569 = vset.pattern.permute.xlu0 %v1638_v1 }
 0x297   : > { %1567 = vset.pattern.permute.xlu2 %v1638_v1  ;;  %1317 = vperm.xlu0 %1569, %v1299_v34  }
 0x298   : > { %1302 = vperm.xlu2 %1567, %v1296_v32  }
 0x29e   : > { %1568 = vset.pattern.permute.xlu1 %v1638_v1  ;;  %v1331_v1 = vld [vmem:[%s2507_s6 + $0x18] sm:$0xff] }
 0x29f   : > { %1307 = vperm.xlu1 %1568, %v1297_v41  }
 0x2a0   : > { %1312 = vperm.xlu2 %1567, %v1298_v42  }
 0x2a7   : > { %1334 = vperm.xlu1 %1568, %v1328_v47  }
 0x2a8   : > { %1339 = vperm.xlu2 %1567, %v1329_v48  }
 0x2a9   : > { %v1169_v22 = vpop.permute.xlu2 %1168 }
 0x2af   : > { %1344 = vperm.xlu1 %1568, %v1330_v36  }
 0x2b0   : > { %1349 = vperm.xlu2 %1567, %v1331_v1  }
 0x2b1   : > { %v1175_v46 = vpop.permute.xlu2 %1174 }
 0x2b9   : > { %v1181_v26 = vpop.permute.xlu2 %1180 }
 0x2c0   : > { %v1167_v23 = vpop.permute.xlu1 %1166  ;;  %v1171_v15 = vpop.permute.xlu0 %1170 }
 0x2c1   : > { %v1187_v60 = vpop.permute.xlu2 %1186  ;;  %v1191_v63 = vsel %vm1190_vm15, %v1167_v23, %v1169_v22  ;;  %v1192_v29 = vsel %vm1190_vm15, %v1169_v22, %v1171_v15 }
 0x2c2   : > { %v1207_v13 = vadd.f32 %v1191_v63, %v2316_v61  ;;  %v1208_v3 = vadd.f32 %v1192_v29, %v2319_v10 }
 0x2c8   : > { %v1173_v62 = vpop.permute.xlu1 %1172  ;;  %v1177_v4 = vpop.permute.xlu0 %1176 }
 0x2c9   : > { %v1218_v19 = vpop.permute.xlu2 %1217  ;;  %v1193_v25 = vsel %vm1190_vm15, %v1173_v62, %v1175_v46  ;;  %v1194_v16 = vsel %vm1190_vm15, %v1175_v46, %v1177_v4 }
 0x2ca   : > { %v2401_v24 = vadd.f32 %v1193_v25, %v2296_v9  ;;  %v2404_v38 = vadd.f32 %v1194_v16, %v2299_v5 }
 0x2d0   : > { %v1179_v20 = vpop.permute.xlu1 %1178  ;;  %v1183_v17 = vpop.permute.xlu0 %1182 }
 0x2d1   : > { %v1224_v49 = vpop.permute.xlu2 %1223  ;;  %v1195_v33 = vsel %vm1190_vm15, %v1179_v20, %v1181_v26  ;;  %v1196_v27 = vsel %vm1190_vm15, %v1181_v26, %v1183_v17 }
 0x2d2   : > { %v2409_v6 = vadd.f32 %v1195_v33, %v2322_v12  ;;  %v2412_v50 = vadd.f32 %v1196_v27, %v2325_v52 }
 0x2d8   : > { %v1185_v35 = vpop.permute.xlu1 %1184  ;;  %v1189_v61 = vpop.permute.xlu0 %1188 }
 0x2d9   : > { %v2414_v9 = vpop.permute.xlu2 %1229  ;;  %v1197_v5 = vsel %vm1190_vm15, %v1185_v35, %v1187_v60  ;;  %v1198_v10 = vsel %vm1190_vm15, %v1187_v60, %v1189_v61 }
 0x2da   : > { %v1213_v44 = vadd.f32 %v1197_v5, %v2327_v53  ;;  %v1214_v18 = vadd.f32 %v1198_v10, %v2329_v11 }
 0x2e0   : > { %v1216_v45 = vpop.permute.xlu1 %1215  ;;  %v1220_v43 = vpop.permute.xlu0 %1219 }
 0x2e1   : > { %v1236_v0 = vpop.permute.xlu2 %1235  ;;  %v1241_v57 = vsel %vm1239_vm0, %v1218_v19, %v1220_v43  ;;  %v1240_v53 = vsel %vm1239_vm0, %v1216_v45, %v1218_v19 }
 0x2e2   : > { %v1256_v11 = vsel %vm532_vm11, %v1240_v53, 0.0  ;;  %v1257_v54 = vsel %vm533_vm12, %v1241_v57, 0.0 }
 0x2e8   : > { %v1222_v12 = vpop.permute.xlu1 %1221  ;;  %v1226_v30 = vpop.permute.xlu0 %1225 }
 0x2e9   : > { %v1270_v59 = vpop.permute.xlu2 %1269  ;;  %v1243_v41 = vsel %vm1239_vm0, %v1224_v49, %v1226_v30  ;;  %v1242_v42 = vsel %vm1239_vm0, %v1222_v12, %v1224_v49 }
 0x2ea   : > { %v1259_v36 = vsel %vm533_vm12, %v1243_v41, 0.0  ;;  %v1258_v1 = vsel %vm532_vm11, %v1242_v42, 0.0 }
 0x2eb   : > { %v1282_v63 = vmul.f32 %v1270_v59, %v1258_v1  ;;  %v1283_v29 = vmul.f32 %v1270_v59, %v1259_v36 }
 0x2ed   : > { %v1290_v25 = vadd.f32 %v1282_v63, %v2401_v24  ;;  %v1291_v16 = vadd.f32 %v1283_v29, %v2404_v38 }
 0x2f0   : > { %v1228_v52 = vpop.permute.xlu1 %1227  ;;  %v1232_v2 = vpop.permute.xlu0 %1231 }
 0x2f1   : > { %v1245_v35 = vsel %vm1239_vm0, %v2414_v9, %v1232_v2  ;;  %v1244_v24 = vsel %vm1239_vm0, %v1228_v52, %v2414_v9 }
 0x2f2   : > { %v1303_v8 = vpop.permute.xlu2 %1302 }
 0x2f8   : > { %v1234_v40 = vpop.permute.xlu1 %1233  ;;  %v1238_v7 = vpop.permute.xlu0 %1237 }
 0x2f9   : > { %v1247_v34 = vsel %vm1239_vm0, %v1236_v0, %v1238_v7  ;;  %v1246_v37 = vsel %vm1239_vm0, %v1234_v40, %v1236_v0 }
 0x2fa   : > { %v2420_v14 = vpop.permute.xlu2 %1312  ;;  %v1262_v47 = vsel %vm532_vm11, %v1246_v37, 0.0  ;;  %v1263_v48 = vsel %vm533_vm12, %v1247_v34, 0.0 }
 0x300   : > { %v1266_v51 = vpop.permute.xlu1 %1265  ;;  %v1274_v21 = vpop.permute.xlu0 %1273 }
 0x301   : > { %v1280_v58 = vmul.f32 %v1266_v51, %v1256_v11  ;;  %v1281_v39 = vmul.f32 %v1266_v51, %v1257_v54 }
 0x302   : > { %v1340_v32 = vpop.permute.xlu2 %1339 }
 0x303   : > { %v1288_v28 = vadd.f32 %v1280_v58, %v1207_v13  ;;  %v1289_v31 = vadd.f32 %v1281_v39, %v1208_v3 }
 0x305   : > { %v1320_v0 = vmul.f32 %v1303_v8, %v1288_v28  ;;  %v1321_v12 = vmul.f32 %v1303_v8, %v1289_v31 }
 0x308   : > { %v1278_v22 = vpop.permute.xlu1 %1277 }
 0x309   : > { %v1286_v46 = vmul.f32 %v1278_v22, %v1262_v47  ;;  %v1287_v26 = vmul.f32 %v1278_v22, %v1263_v48  ;;  %v1318_v23 = vpop.permute.xlu0 %1317 }
 0x30a   : > { %v1350_v62 = vpop.permute.xlu2 %1349 }
 0x30b   : > { %v1294_v15 = vadd.f32 %v1286_v46, %v1213_v44  ;;  %v1295_v60 = vadd.f32 %v1287_v26, %v1214_v18  ;;  %v1260_v44 = vsel %vm532_vm11, %v1244_v24, 0.0  ;;  %v1261_v18 = vsel %vm533_vm12, %v1245_v35, 0.0 }
 0x30c   : > { %v1284_v45 = vmul.f32 %v1274_v21, %v1260_v44  ;;  %v1285_v43 = vmul.f32 %v1274_v21, %v1261_v18 }
 0x30d   : > { %v1326_v13 = vmul.f32 %v1318_v23, %v1294_v15  ;;  %v1327_v3 = vmul.f32 %v1318_v23, %v1295_v60 }
 0x30e   : > { %v1292_v52 = vadd.f32 %v1284_v45, %v2409_v6  ;;  %v1293_v55 = vadd.f32 %v1285_v43, %v2412_v50 }
 0x30f   : > { %v1358_v4 = vadd.f32 %v1350_v62, %v1326_v13  ;;  %v1359_v19 = vadd.f32 %v1350_v62, %v1327_v3 }
 0x310   : > { %v1324_v8 = vmul.f32 %v2420_v14, %v1292_v52  ;;  %v1325_v40 = vmul.f32 %v2420_v14, %v1293_v55 }
 0x311   : > { %v1366_v20 = vmax.f32 %v1358_v4, 0.0  ;;  %v1367_v17 = vmax.f32 %v1359_v19, 0.0  ;;  %v1308_v49 = vpop.permute.xlu1 %1307 }
 0x312   : > { %v1322_v33 = vmul.f32 %v1308_v49, %v1290_v25  ;;  %v1323_v27 = vmul.f32 %v1308_v49, %v1291_v16 }
 0x313   : > { %1374 = vst [vmem:[%s2445_s16 + $0x30] sm:$0xff] %v1366_v20 }
 0x314   : > { %1375 = vst [vmem:[%s2445_s16 + $0x38] sm:$0xff] %v1367_v17  ;;  %v1354_v38 = vadd.f32 %v1340_v32, %v1322_v33  ;;  %v1355_v61 = vadd.f32 %v1340_v32, %v1323_v27 }
 0x316   : > { %v1362_v5 = vmax.f32 %v1354_v38, 0.0  ;;  %v1363_v10 = vmax.f32 %v1355_v61, 0.0 }
 0x318   : > { %1370 = vst [vmem:[%s2445_s16 + $0x10] sm:$0xff] %v1362_v5 }
 0x319   : > { %1371 = vst [vmem:[%s2445_s16 + $0x18] sm:$0xff] %v1363_v10  ;;  %v1335_v9 = vpop.permute.xlu1 %1334 }
 0x31a   : > { %v1352_v30 = vadd.f32 %v1335_v9, %v1320_v0  ;;  %v1353_v59 = vadd.f32 %v1335_v9, %v1321_v12 }
 0x31c   : > { %v1360_v2 = vmax.f32 %v1352_v30, 0.0  ;;  %v1361_v56 = vmax.f32 %v1353_v59, 0.0 }
 0x31e   : > { %1368 = vst [vmem:[%s2445_s16] sm:$0xff] %v1360_v2 }
 0x31f   : > { %1369 = vst [vmem:[%s2445_s16 + $0x8] sm:$0xff] %v1361_v56 }
 0x321   : > { %v1345_v7 = vpop.permute.xlu1 %1344 }
 0x322   : > { %v1356_v6 = vadd.f32 %v1345_v7, %v1324_v8  ;;  %v1357_v50 = vadd.f32 %v1345_v7, %v1325_v40 }
 0x324   : > { %v1364_v57 = vmax.f32 %v1356_v6, 0.0  ;;  %v1365_v53 = vmax.f32 %v1357_v50, 0.0 }
 0x326   : > { %1372 = vst [vmem:[%s2445_s16 + $0x20] sm:$0xff] %v1364_v57 }
 0x327   : > { %1373 = vst [vmem:[%s2445_s16 + $0x28] sm:$0xff] %v1365_v53 }
 0x328   : > { %1601 = shalt.err (!%p1598_p3)
}
 0x329   : > { %s1657_s13 = smov 256   ;;  %s1658_s16 = smov 16  }
 0x32a   : > { %1480 = dma.vmem_to_hbm [thread:$0]  (%p1737_p5), %s1390_s28, 1024, %s1392_s20, %s1377_s21, %s1657_s13, %s1657_s13, %s1658_s16  }
 0x32b PF: > { %p1486_p4 = scmp.ge.s32.totalorder %s1636_s27, 2  ;;  %s1406_s17 = sand.u32 1, %s1624_s24  }
 0x32c   : > { %s1407_s18 = scalar_lea.sflag [#allocation4], %s1406_s17 }
 0x32d   : > { %p1483_p7 = pnand %p1486_p4, %p1741_p6 }
 0x32f   : > { %p1484_p8 = pneg %p1483_p7 }
 0x331   : > { %1619 = dma.done.wait (%p1484_p8), %s1407_s18, 1024  }
 0x332   : > { %1621 = vsyncadd (%p1484_p8), %s1407_s18, 4294966272  ;;  %p17_p9 = scmp.ge.s32.totalorder %s1724_s30, 4   ;;  %s2511_s24 = smov %s1628_s25 }
 0x333   : > { %s2512_s25 = smov %s1632_s26  ;;  %s2513_s26 = smov %s1735_s10 }
 0x334   : > { %s2514_s27 = smov %s1724_s30  ;;  %19 = sbr.rel (!%p17_p9) target bundleno = 3 (0x3), region = 83 }
 0x339   :  { %1413 = vsyncpa [#allocation4], 1 }
 0x33a   :  { %1415 = vsyncpa [#allocation4 + $0x1], 1 }

</bundles_post_ra>
